<compile_context>
chip_gen: v6e
topology: v6e:2x2x1
jax: 0.10.0
libtpu: 0.0.40
codegen_flags: <defaults>
</compile_context>

<pallas_src>
import math
import warnings

import jax
import jax.numpy as jnp
from jax.experimental import pallas as pl
from jax.experimental.pallas import tpu as pltpu

# ---------------- scaled config (synthetic "aesthetic-shadow-v2") ----------------
IMG_IN = 16          # input spatial size
RESIZE = 32          # analog of the 1024x1024 resize
CHANNELS = 3
PATCH = 8
GRID_P = RESIZE // PATCH
NUM_PATCHES = GRID_P * GRID_P
SEQ = NUM_PATCHES + 1               # +CLS token (17)
SEQ_PAD = 32                        # pad tokens so row blocks are (8,128)/(16,128) tile aligned
HIDDEN = 32
HEADS = 2
HEAD_DIM = HIDDEN // HEADS
MLP_DIM = 4 * HIDDEN                # 128
LAYERS = 2
NUM_LABELS = 2                      # aesthetic-shadow-v2: {hq, lq}
OUT_LANES = 128                     # lane-dense logits block (sliced to NUM_LABELS on host)
LN_EPS = 1e-12                      # HF ViT layer_norm_eps
ATTN_SCALE = 1.0 / math.sqrt(HEAD_DIM)
CPP = CHANNELS * PATCH * PATCH      # flattened patch features, (C, ph, pw) order

assert HIDDEN % HEADS == 0
assert 3 * HIDDEN + HIDDEN == 128 and MLP_DIM == 128, "weight-slab packing assumes 128-lane rows"
assert SEQ_PAD % 16 == 0 and SEQ <= SEQ_PAD

MEAN = jnp.array([0.65463551, 0.60715182, 0.61108185], jnp.float32)
STD = jnp.array([0.32903292, 0.32726001, 0.31909652], jnp.float32)


# ---------------- GELU: exact erf (EUP) when it lowers, else tanh approx (EUP) ----------------
def _erf_probe():
    def _probe(x_ref, o_ref):
        o_ref[...] = jax.lax.erf(x_ref[...])
    try:
        out = pl.pallas_call(
            _probe, out_shape=jax.ShapeDtypeStruct((8, 128), jnp.float32)
        )(jnp.zeros((8, 128), jnp.float32))
        jax.block_until_ready(out)
        return True
    except Exception:
        return False


_HAS_ERF = _erf_probe()
if not _HAS_ERF:
    warnings.warn("Pallas: lax.erf does not lower on this build; using tanh-approx GELU.")


def _gelu(x):
    if _HAS_ERF:
        return 0.5 * x * (1.0 + jax.lax.erf(x * 0.7071067811865476))
    # tanh approximation rides the EUP slot instead of a ~12-op VPU polynomial
    return 0.5 * x * (1.0 + jnp.tanh(0.7978845608028654 * (x + 0.044715 * (x * x * x))))


def _layernorm(x, g, b):
    mu = jnp.mean(x, axis=-1, keepdims=True)
    var = jnp.mean(jnp.square(x - mu), axis=-1, keepdims=True)
    return (x - mu) * jax.lax.rsqrt(var + LN_EPS) * g + b


# ---------------- the fused ViT kernel: grid = (batch_block, layer) ----------------
def vit_kernel(patch_ref, pw_ref, add_ref, lvec_ref, lw_ref, hvec_ref, cw_ref,
               out_ref, hs_ref):
    l = pl.program_id(1)
    f32, bf16 = jnp.float32, jnp.bfloat16
    rows = patch_ref.shape[0]            # BT * SEQ_PAD
    bt = rows // SEQ_PAD

    # ----- patch embedding: Normalize, conv bias, CLS token and pos table folded into pw/add.
    #       One matmul over all BT images + one full-tile store; only at layer step 0. -----
    @pl.when(l == 0)
    def _embed():
        hs_ref[...] = jnp.dot(patch_ref[...], pw_ref[...],
                              preferred_element_type=f32) + add_ref[...]

    x = hs_ref[...]                                                   # (rows, H) f32, VMEM-resident

    # per-layer LN/bias slab (8,128) f32
    vec = lvec_ref[0]
    ln1g, ln1b = vec[0:1, 0:HIDDEN], vec[1:2, 0:HIDDEN]
    bqkv, bo = vec[2:3, 0:3 * HIDDEN], vec[3:4, 0:HIDDEN]
    ln2g, ln2b = vec[4:5, 0:HIDDEN], vec[5:6, 0:HIDDEN]
    b1, b2 = vec[6:7, 0:MLP_DIM], vec[7:8, 0:HIDDEN]

    # per-layer weight slab (96,128) bf16: [Wqkv|Wo] / W1 / W2^T stacked along sublanes
    w = lw_ref[0]
    wqkv = w[0:HIDDEN, 0:3 * HIDDEN]                                  # (H, 3H)
    wo = w[0:HIDDEN, 3 * HIDDEN:4 * HIDDEN]                           # (H, H)
    w1 = w[HIDDEN:2 * HIDDEN, :]                                      # (H, MLP)
    w2t = w[2 * HIDDEN:3 * HIDDEN, :]                                 # (H, MLP) == W2^T

    # ----- attention (pre-LN): one fused QKV matmul over all BT*SEQ_PAD rows -----
    ln1 = _layernorm(x, ln1g, ln1b)
    qkv = jnp.dot(ln1.astype(bf16), wqkv, preferred_element_type=f32) + bqkv
    qkv3 = qkv.reshape(bt, SEQ_PAD, 3 * HIDDEN).astype(bf16)          # 8/16-aligned row split

    # additive mask: padded key tokens (index >= SEQ) never attend
    kidx = jax.lax.broadcasted_iota(jnp.int32, (1, SEQ_PAD, SEQ_PAD), 2)
    kmask = jnp.where(kidx < SEQ, 0.0, -1e30).astype(f32)

    ctx_heads = []
    # TODO(synk): at the real model's 16 heads, replace this static unroll with a heads-batched
    # dot_general / fori_loop to bound vreg live ranges; HEADS=2 here so the unroll is tiny.
    for h in range(HEADS):
        q = qkv3[:, :, h * HEAD_DIM:(h + 1) * HEAD_DIM]
        k = qkv3[:, :, HIDDEN + h * HEAD_DIM:HIDDEN + (h + 1) * HEAD_DIM]
        v = qkv3[:, :, 2 * HIDDEN + h * HEAD_DIM:2 * HIDDEN + (h + 1) * HEAD_DIM]
        s = jax.lax.dot_general(q, k, (((2,), (2,)), ((0,), (0,))),
                                preferred_element_type=f32) * ATTN_SCALE + kmask
        s = s - jnp.max(s, axis=-1, keepdims=True)
        p = jnp.exp(s)
        p = p * pl.reciprocal(jnp.sum(p, axis=-1, keepdims=True), approx=False)
        ctx_heads.append(jax.lax.dot_general(p.astype(bf16), v, (((2,), (1,)), ((0,), (0,))),
                                             preferred_element_type=f32))      # (BT, SEQ_PAD, HD)

    # merge heads along lanes; single out-projection matmul over all rows (no per-head accumulation)
    ctx = jnp.concatenate(ctx_heads, axis=-1).reshape(rows, HIDDEN)
    attn = x + jnp.dot(ctx.astype(bf16), wo, preferred_element_type=f32) + bo

    # ----- MLP (pre-LN) over all BT*SEQ_PAD rows -----
    ln2 = _layernorm(attn, ln2g, ln2b)
    mid = _gelu(jnp.dot(ln2.astype(bf16), w1, preferred_element_type=f32) + b1)
    y = attn + jax.lax.dot_general(mid.astype(bf16), w2t, (((1,), (1,)), ((), ())),
                                   preferred_element_type=f32) + b2
    hs_ref[...] = y

    # ----- final LN on CLS rows + classifier; lane-dense (BT, 128) logits block -----
    @pl.when(l == LAYERS - 1)
    def _head():
        lnfg, lnfb = hvec_ref[0:1, 0:HIDDEN], hvec_ref[1:2, 0:HIDDEN]
        cb = hvec_ref[2:3, :]                                         # (1, 128)
        cls_rows = y.reshape(bt, SEQ_PAD, HIDDEN)[:, 0, :]            # (BT, H)
        c = _layernorm(cls_rows, lnfg, lnfb)
        out_ref[0] = jnp.dot(c.astype(jnp.bfloat16), cw_ref[...],
                             preferred_element_type=f32) + cb


# ---------------- host-side wrapper ----------------
def _vit_forward(patches, pk, block_batch=None):
    """patches: (B, SEQ_PAD, CPP) bf16; row 0 = zero CLS slot, rows >= SEQ are zero padding."""
    B = patches.shape[0]
    # BT*SEQ_PAD ~ 128 rows fills the v5e 128-row MXU; use ~256//SEQ_PAD on v6e/v7x.
    BT = block_batch if block_batch is not None else max(1, min(B, 128 // SEQ_PAD))
    n_blk = -(-B // BT)
    B_pad = n_blk * BT
    if B_pad != B:
        patches = jnp.pad(patches, ((0, B_pad - B), (0, 0), (0, 0)))
    rows = BT * SEQ_PAD

    patches2d = patches.reshape(B_pad * SEQ_PAD, CPP)                 # lane-dense 2D slab
    add = jnp.tile(pk["add"], (BT, 1))                                # (rows, H) f32

    in_specs = [
        pl.BlockSpec((rows, CPP), lambda b, l: (b, 0)),               # patches (bf16), per batch block
        pl.BlockSpec((CPP, HIDDEN), lambda b, l: (0, 0)),             # folded patch-embed weight (bf16)
        pl.BlockSpec((rows, HIDDEN), lambda b, l: (0, 0)),            # folded cls/pos/bias add table
        pl.BlockSpec((1, 8, 128), lambda b, l: (l, 0, 0)),            # per-layer LN/bias slab (f32)
        pl.BlockSpec((1, 3 * HIDDEN, 128), lambda b, l: (l, 0, 0)),   # per-layer weight slab (bf16)
        pl.BlockSpec((8, 128), lambda b, l: (0, 0)),                  # final-LN / classifier-bias slab
        pl.BlockSpec((HIDDEN, OUT_LANES), lambda b, l: (0, 0)),       # classifier weight (bf16, padded)
    ]

    out = pl.pallas_call(
        vit_kernel,
        grid=(n_blk, LAYERS),
        in_specs=in_specs,
        out_specs=pl.BlockSpec((1, BT, OUT_LANES), lambda b, l: (b, 0, 0)),
        out_shape=jax.ShapeDtypeStruct((n_blk, BT, OUT_LANES), jnp.float32),
        scratch_shapes=[pltpu.VMEM((rows, HIDDEN), jnp.float32)],     # VMEM-resident hidden state
        compiler_params=pltpu.CompilerParams(
            dimension_semantics=("parallel", "arbitrary")),
    )(patches2d, pk["pw"], add, pk["lvec"], pk["lw"], pk["hvec"], pk["cw"])

    return out.reshape(B_pad, OUT_LANES)[:B, :NUM_LABELS]


def _pack_params(params):
    """Fold Normalize/CLS/pos/biases into kernel-friendly slabs; matmul weights in bf16."""
    # torchvision Normalize folded into the patch-embed matmul
    inv_std = jnp.repeat(1.0 / STD, PATCH * PATCH)                    # (CPP,), (C, ph, pw) order
    shift = jnp.repeat(MEAN / STD, PATCH * PATCH)
    pw = params["patch_w"] * inv_std[:, None]                         # W' = W / std_c
    pb = params["patch_b"] - shift @ params["patch_w"]                # b' = b - (mean/std) @ W

    # additive table: CLS is fed as a zero input row, so row 0 holds cls+pos[0] and patch rows
    # hold pos[1:]+pb'; padded token rows are zero.
    pos = params["pos"].reshape(SEQ, HIDDEN)
    cls = params["cls"].reshape(HIDDEN)
    add = jnp.concatenate([(cls + pos[0])[None, :], pos[1:] + pb[None, :]], axis=0)
    add = jnp.pad(add, ((0, SEQ_PAD - SEQ), (0, 0)))

    def vec_slab(lp):
        v = jnp.zeros((8, 128), jnp.float32)
        v = v.at[0, :HIDDEN].set(lp["ln1_g"]).at[1, :HIDDEN].set(lp["ln1_b"])
        v = v.at[2, :3 * HIDDEN].set(jnp.concatenate([lp["bq"], lp["bk"], lp["bv"]]))
        v = v.at[3, :HIDDEN].set(lp["bo"])
        v = v.at[4, :HIDDEN].set(lp["ln2_g"]).at[5, :HIDDEN].set(lp["ln2_b"])
        v = v.at[6, :MLP_DIM].set(lp["b1"]).at[7, :HIDDEN].set(lp["b2"])
        return v

    def w_slab(lp):
        row_qkv_o = jnp.concatenate([lp["wq"], lp["wk"], lp["wv"], lp["wo"]], axis=1)  # (H, 128)
        return jnp.concatenate([row_qkv_o, lp["w1"], lp["w2"].T], axis=0)              # (96, 128)

    lvec = jnp.stack([vec_slab(lp) for lp in params["layers"]])                        # (L, 8, 128)
    lw = jnp.stack([w_slab(lp) for lp in params["layers"]]).astype(jnp.bfloat16)       # (L, 96, 128)

    hvec = jnp.zeros((8, 128), jnp.float32)
    hvec = hvec.at[0, :HIDDEN].set(params["ln_f_g"]).at[1, :HIDDEN].set(params["ln_f_b"])
    hvec = hvec.at[2, :NUM_LABELS].set(params["cls_b"])
    cw = jnp.zeros((HIDDEN, OUT_LANES), jnp.float32).at[:, :NUM_LABELS].set(params["cls_w"])

    return dict(pw=pw.astype(jnp.bfloat16), add=add, lvec=lvec, lw=lw,
                hvec=hvec, cw=cw.astype(jnp.bfloat16))


# ---------------- synthetic deterministic parameters ----------------
def init_params(seed=0):
    key = jax.random.PRNGKey(seed)

    def nxt():
        nonlocal key
        key, sub = jax.random.split(key)
        return sub

    def w(shape):
        return 0.02 * jax.random.normal(nxt(), shape, jnp.float32)

    params = dict(
        # Conv2d(C, HIDDEN, PATCH, stride=PATCH) weight flattened in (C, ph, pw) order
        patch_w=w((CPP, HIDDEN)),
        patch_b=jnp.zeros((HIDDEN,), jnp.float32),
        cls=w((1, 1, HIDDEN)),
        pos=w((1, SEQ, HIDDEN)),
        layers=[],
        ln_f_g=jnp.ones((HIDDEN,), jnp.float32),
        ln_f_b=jnp.zeros((HIDDEN,), jnp.float32),
        cls_w=w((HIDDEN, NUM_LABELS)),
        cls_b=jnp.zeros((NUM_LABELS,), jnp.float32),
    )
    for _ in range(LAYERS):
        params["layers"].append(dict(
            ln1_g=jnp.ones((HIDDEN,), jnp.float32), ln1_b=jnp.zeros((HIDDEN,), jnp.float32),
            wq=w((HIDDEN, HIDDEN)), bq=jnp.zeros((HIDDEN,), jnp.float32),
            wk=w((HIDDEN, HIDDEN)), bk=jnp.zeros((HIDDEN,), jnp.float32),
            wv=w((HIDDEN, HIDDEN)), bv=jnp.zeros((HIDDEN,), jnp.float32),
            wo=w((HIDDEN, HIDDEN)), bo=jnp.zeros((HIDDEN,), jnp.float32),
            ln2_g=jnp.ones((HIDDEN,), jnp.float32), ln2_b=jnp.zeros((HIDDEN,), jnp.float32),
            w1=w((HIDDEN, MLP_DIM)), b1=jnp.zeros((MLP_DIM,), jnp.float32),
            w2=w((MLP_DIM, HIDDEN)), b2=jnp.zeros((HIDDEN,), jnp.float32),
        ))
    return params


# ---------------- forward (ShadowAesthetic.score) ----------------
def shadow_aesthetic_score(pixels, params):
    dtype = pixels.dtype
    B, C, H, W = pixels.shape

    # torchvision Resize(interpolation=2) == bilinear (upsample -> no antialias)
    # TODO(synk): bilinear resize stays as jax.image.resize (gather-heavy; no clean Pallas win here).
    x = jax.image.resize(pixels.astype(jnp.float32), (B, C, RESIZE, RESIZE), method="bilinear")
    x = x.astype(dtype).astype(jnp.float32)     # pixels.to(dtype=dtype) analog (no-op for f32 input)

    # Patch im2col: (B, C, Gp, P, Gp, P) -> (B, NP, C*P*P) in (C, ph, pw) feature order.
    # Pure layout op, left to XLA; Normalize is folded into the patch weights instead.
    p = x.reshape(B, C, GRID_P, PATCH, GRID_P, PATCH)
    p = p.transpose(0, 2, 4, 1, 3, 5).reshape(B, NUM_PATCHES, CPP)
    # Prepend the (zero) CLS input row and pad tokens to SEQ_PAD; activations in bf16.
    p = jnp.pad(p, ((0, 0), (1, SEQ_PAD - SEQ), (0, 0))).astype(jnp.bfloat16)

    pk = _pack_params(params)
    logits = _vit_forward(p, pk)                # one fused pallas_call for the whole ViT
    return jnp.squeeze(logits)                  # outputs.logits.squeeze()


if __name__ == "__main__":
    key = jax.random.PRNGKey(0)
    pixels = jax.random.uniform(key, (2, CHANNELS, IMG_IN, IMG_IN), jnp.float32)
    params = init_params(seed=0)
    fwd = jax.jit(shadow_aesthetic_score)
    out = fwd(pixels, params)
    jax.block_until_ready(out)
    assert out.shape == (2, NUM_LABELS)
    assert bool(jnp.all(jnp.isfinite(out)))
    print("KERNEL_OK")
</pallas_src>

<mosaic_0001>
module attributes {stable_mosaic.version = 11 : i64} {
  func.func @_probe(%arg0: memref<8x128xf32, #tpu.memory_space<vmem>>, %arg1: memref<8x128xf32, #tpu.memory_space<vmem>>) attributes {dimension_semantics = [], scalar_prefetch = 0 : i64, scratch_operands = 0 : i64, tpu.core_type = #tpu.core_type<tc>} {
    %c0 = arith.constant 0 : index
    %c0_0 = arith.constant 0 : index
    %0 = vector.load %arg0[%c0, %c0_0] : memref<8x128xf32, #tpu.memory_space<vmem>>, vector<8x128xf32>
    %1 = math.erf %0 : vector<8x128xf32>
    %c0_1 = arith.constant 0 : index
    %c0_2 = arith.constant 0 : index
    %2 = vector.load %arg1[%c0_1, %c0_2] : memref<8x128xf32, #tpu.memory_space<vmem>>, vector<8x128xf32>
    tpu.vector_store %arg1[%c0_1, %c0_2], %1 {strides = array<i32>} : memref<8x128xf32, #tpu.memory_space<vmem>>, vector<8x128xf32>,
    return
  }
}

module attributes {stable_mosaic.version = 11 : i64} {
  func.func @vit_kernel(%arg0: i32, %arg1: i32, %arg2: memref<64x192xbf16, #tpu.memory_space<vmem>>, %arg3: memref<192x32xbf16, #tpu.memory_space<vmem>>, %arg4: memref<64x32xf32, #tpu.memory_space<vmem>>, %arg5: memref<1x8x128xf32, #tpu.memory_space<vmem>>, %arg6: memref<1x96x128xbf16, #tpu.memory_space<vmem>>, %arg7: memref<8x128xf32, #tpu.memory_space<vmem>>, %arg8: memref<32x128xbf16, #tpu.memory_space<vmem>>, %arg9: memref<1x2x128xf32, #tpu.memory_space<vmem>>, %arg10: memref<64x32xf32, #tpu.memory_space<vmem>>) attributes {dimension_semantics = [#tpu.dimension_semantics<parallel>, #tpu.dimension_semantics<arbitrary>], iteration_bounds = array<i64: 1, 2>, scalar_prefetch = 0 : i64, scratch_operands = 1 : i64, tpu.core_type = #tpu.core_type<tc>, window_params = [{transform_indices = @transform_0, window_bounds = array<i64: 64, 192>}, {pipeline_mode = #tpu.pipeline_mode<synchronous>, transform_indices = @transform_1, window_bounds = array<i64: 192, 32>}, {pipeline_mode = #tpu.pipeline_mode<synchronous>, transform_indices = @transform_2, window_bounds = array<i64: 64, 32>}, {transform_indices = @transform_3, window_bounds = array<i64: 1, 8, 128>}, {transform_indices = @transform_4, window_bounds = array<i64: 1, 96, 128>}, {pipeline_mode = #tpu.pipeline_mode<synchronous>, transform_indices = @transform_5, window_bounds = array<i64: 8, 128>}, {pipeline_mode = #tpu.pipeline_mode<synchronous>, transform_indices = @transform_6, window_bounds = array<i64: 32, 128>}, {transform_indices = @transform_7, window_bounds = array<i64: 1, 2, 128>}]} {
    %c0_i32 = arith.constant 0 : i32
    %0 = arith.cmpi eq, %arg1, %c0_i32 : i32
    %1 = arith.extui %0 : i1 to i32
    %c0_i32_0 = arith.constant 0 : i32
    %2 = arith.cmpi ne, %1, %c0_i32_0 : i32
    scf.if %2 {
      %c0_40 = arith.constant 0 : index
      %c0_41 = arith.constant 0 : index
      %149 = vector.load %arg2[%c0_40, %c0_41] : memref<64x192xbf16, #tpu.memory_space<vmem>>, vector<64x192xbf16>
      %c0_42 = arith.constant 0 : index
      %c0_43 = arith.constant 0 : index
      %150 = vector.load %arg3[%c0_42, %c0_43] : memref<192x32xbf16, #tpu.memory_space<vmem>>, vector<192x32xbf16>
      %cst_44 = arith.constant dense<0.000000e+00> : vector<64x32xf32>
      %151 = tpu.matmul %149, %150, %cst_44 {dimension_numbers = #tpu.dot_dimension_numbers<[1], [0], [0], [1], [0, 0, 1, 1], [], []>} : vector<64x192xbf16>, vector<192x32xbf16>, vector<64x32xf32> -> vector<64x32xf32>
      %c0_45 = arith.constant 0 : index
      %c0_46 = arith.constant 0 : index
      %152 = vector.load %arg4[%c0_45, %c0_46] : memref<64x32xf32, #tpu.memory_space<vmem>>, vector<64x32xf32>
      %153 = arith.addf %151, %152 : vector<64x32xf32>
      %c0_47 = arith.constant 0 : index
      %c0_48 = arith.constant 0 : index
      %154 = vector.load %arg10[%c0_47, %c0_48] : memref<64x32xf32, #tpu.memory_space<vmem>>, vector<64x32xf32>
      tpu.vector_store %arg10[%c0_47, %c0_48], %153 {strides = array<i32>} : memref<64x32xf32, #tpu.memory_space<vmem>>, vector<64x32xf32>,
    } else {
    }
    %c0 = arith.constant 0 : index
    %c0_1 = arith.constant 0 : index
    %3 = vector.load %arg10[%c0, %c0_1] : memref<64x32xf32, #tpu.memory_space<vmem>>, vector<64x32xf32>
    %c0_2 = arith.constant 0 : index
    %c0_3 = arith.constant 0 : index
    %c0_4 = arith.constant 0 : index
    %4 = vector.load %arg5[%c0_2, %c0_3, %c0_4] : memref<1x8x128xf32, #tpu.memory_space<vmem>>, vector<1x8x128xf32>
    %5 = vector.shape_cast %4 : vector<1x8x128xf32> to vector<8x128xf32>
    %6 = vector.extract_strided_slice %5 {offsets = [0, 0], sizes = [1, 32], strides = [1, 1]} : vector<8x128xf32> to vector<1x32xf32>
    %7 = vector.extract_strided_slice %5 {offsets = [1, 0], sizes = [1, 32], strides = [1, 1]} : vector<8x128xf32> to vector<1x32xf32>
    %8 = vector.extract_strided_slice %5 {offsets = [2, 0], sizes = [1, 96], strides = [1, 1]} : vector<8x128xf32> to vector<1x96xf32>
    %9 = vector.extract_strided_slice %5 {offsets = [3, 0], sizes = [1, 32], strides = [1, 1]} : vector<8x128xf32> to vector<1x32xf32>
    %10 = vector.extract_strided_slice %5 {offsets = [4, 0], sizes = [1, 32], strides = [1, 1]} : vector<8x128xf32> to vector<1x32xf32>
    %11 = vector.extract_strided_slice %5 {offsets = [5, 0], sizes = [1, 32], strides = [1, 1]} : vector<8x128xf32> to vector<1x32xf32>
    %12 = vector.extract_strided_slice %5 {offsets = [6, 0], sizes = [1, 128], strides = [1, 1]} : vector<8x128xf32> to vector<1x128xf32>
    %13 = vector.extract_strided_slice %5 {offsets = [7, 0], sizes = [1, 32], strides = [1, 1]} : vector<8x128xf32> to vector<1x32xf32>
    %c0_5 = arith.constant 0 : index
    %c0_6 = arith.constant 0 : index
    %c0_7 = arith.constant 0 : index
    %14 = vector.load %arg6[%c0_5, %c0_6, %c0_7] : memref<1x96x128xbf16, #tpu.memory_space<vmem>>, vector<1x96x128xbf16>
    %15 = vector.shape_cast %14 : vector<1x96x128xbf16> to vector<96x128xbf16>
    %16 = vector.extract_strided_slice %15 {offsets = [0, 0], sizes = [32, 96], strides = [1, 1]} : vector<96x128xbf16> to vector<32x96xbf16>
    %17 = vector.extract_strided_slice %15 {offsets = [0, 96], sizes = [32, 32], strides = [1, 1]} : vector<96x128xbf16> to vector<32x32xbf16>
    %18 = vector.extract_strided_slice %15 {offsets = [32, 0], sizes = [32, 128], strides = [1, 1]} : vector<96x128xbf16> to vector<32x128xbf16>
    %19 = vector.extract_strided_slice %15 {offsets = [64, 0], sizes = [32, 128], strides = [1, 1]} : vector<96x128xbf16> to vector<32x128xbf16>
    %cst = arith.constant dense<0.000000e+00> : vector<64xf32>
    %20 = vector.multi_reduction <add>, %3, %cst [1] : vector<64x32xf32> to vector<64xf32>
    %21 = vector.shape_cast %20 : vector<64xf32> to vector<64x1xf32>
    %cst_8 = arith.constant 3.200000e+01 : f32
    %22 = vector.broadcast %cst_8 : f32 to vector<64x1xf32>
    %23 = arith.divf %21, %22 : vector<64x1xf32>
    %24 = vector.broadcast %23 : vector<64x1xf32> to vector<64x32xf32>
    %25 = arith.subf %3, %24 : vector<64x32xf32>
    %26 = arith.mulf %25, %25 : vector<64x32xf32>
    %cst_9 = arith.constant dense<0.000000e+00> : vector<64xf32>
    %27 = vector.multi_reduction <add>, %26, %cst_9 [1] : vector<64x32xf32> to vector<64xf32>
    %28 = vector.shape_cast %27 : vector<64xf32> to vector<64x1xf32>
    %cst_10 = arith.constant 3.200000e+01 : f32
    %29 = vector.broadcast %cst_10 : f32 to vector<64x1xf32>
    %30 = arith.divf %28, %29 : vector<64x1xf32>
    %31 = vector.broadcast %23 : vector<64x1xf32> to vector<64x32xf32>
    %32 = arith.subf %3, %31 : vector<64x32xf32>
    %cst_11 = arith.constant 9.99999996E-13 : f32
    %33 = vector.broadcast %cst_11 : f32 to vector<64x1xf32>
    %34 = arith.addf %30, %33 : vector<64x1xf32>
    %35 = math.rsqrt %34 : vector<64x1xf32>
    %36 = vector.broadcast %35 : vector<64x1xf32> to vector<64x32xf32>
    %37 = arith.mulf %32, %36 : vector<64x32xf32>
    %38 = vector.broadcast %6 : vector<1x32xf32> to vector<64x32xf32>
    %39 = arith.mulf %37, %38 : vector<64x32xf32>
    %40 = vector.broadcast %7 : vector<1x32xf32> to vector<64x32xf32>
    %41 = arith.addf %39, %40 : vector<64x32xf32>
    %42 = arith.truncf %41 : vector<64x32xf32> to vector<64x32xbf16>
    %cst_12 = arith.constant dense<0.000000e+00> : vector<64x96xf32>
    %43 = tpu.matmul %42, %16, %cst_12 {dimension_numbers = #tpu.dot_dimension_numbers<[1], [0], [0], [1], [0, 0, 1, 1], [], []>} : vector<64x32xbf16>, vector<32x96xbf16>, vector<64x96xf32> -> vector<64x96xf32>
    %44 = vector.broadcast %8 : vector<1x96xf32> to vector<64x96xf32>
    %45 = arith.addf %43, %44 : vector<64x96xf32>
    %46 = vector.shape_cast %45 : vector<64x96xf32> to vector<2x32x96xf32>
    %47 = arith.truncf %46 : vector<2x32x96xf32> to vector<2x32x96xbf16>
    %48 = tpu.iota {dimensions = array<i32: 2>} : vector<1x32x32xi32>
    %c17_i32 = arith.constant 17 : i32
    %49 = vector.broadcast %c17_i32 : i32 to vector<1x32x32xi32>
    %50 = arith.cmpi slt, %48, %49 : vector<1x32x32xi32>
    %cst_13 = arith.constant 0.000000e+00 : f32
    %cst_14 = arith.constant -1.000000e+30 : f32
    %51 = vector.broadcast %cst_13 : f32 to vector<1x32x32xf32>
    %52 = vector.broadcast %cst_14 : f32 to vector<1x32x32xf32>
    %53 = arith.select %50, %51, %52 : vector<1x32x32xi1>, vector<1x32x32xf32>
    %54 = vector.extract_strided_slice %47 {offsets = [0, 0, 0], sizes = [2, 32, 16], strides = [1, 1, 1]} : vector<2x32x96xbf16> to vector<2x32x16xbf16>
    %55 = vector.extract_strided_slice %47 {offsets = [0, 0, 32], sizes = [2, 32, 16], strides = [1, 1, 1]} : vector<2x32x96xbf16> to vector<2x32x16xbf16>
    %56 = vector.extract_strided_slice %47 {offsets = [0, 0, 64], sizes = [2, 32, 16], strides = [1, 1, 1]} : vector<2x32x96xbf16> to vector<2x32x16xbf16>
    %cst_15 = arith.constant dense<0.000000e+00> : vector<2x32x32xf32>
    %57 = tpu.matmul %54, %55, %cst_15 {dimension_numbers = #tpu.dot_dimension_numbers<[2], [2], [1], [1], [0, 0, 0, 1, 1, 1], [0], [0]>} : vector<2x32x16xbf16>, vector<2x32x16xbf16>, vector<2x32x32xf32> -> vector<2x32x32xf32>
    %cst_16 = arith.constant 2.500000e-01 : f32
    %58 = vector.broadcast %cst_16 : f32 to vector<2x32x32xf32>
    %59 = arith.mulf %57, %58 : vector<2x32x32xf32>
    %60 = vector.broadcast %53 : vector<1x32x32xf32> to vector<2x32x32xf32>
    %61 = arith.addf %59, %60 : vector<2x32x32xf32>
    %cst_17 = arith.constant dense<0xFF800000> : vector<2x32xf32>
    %62 = vector.multi_reduction <maximumf>, %61, %cst_17 [2] : vector<2x32x32xf32> to vector<2x32xf32>
    %63 = vector.shape_cast %62 : vector<2x32xf32> to vector<2x32x1xf32>
    %64 = vector.broadcast %63 : vector<2x32x1xf32> to vector<2x32x32xf32>
    %65 = arith.subf %61, %64 : vector<2x32x32xf32>
    %66 = math.exp %65 : vector<2x32x32xf32>
    %cst_18 = arith.constant dense<0.000000e+00> : vector<2x32xf32>
    %67 = vector.multi_reduction <add>, %66, %cst_18 [2] : vector<2x32x32xf32> to vector<2x32xf32>
    %68 = vector.shape_cast %67 : vector<2x32xf32> to vector<2x32x1xf32>
    %69 = tpu.reciprocal %68 : vector<2x32x1xf32> -> vector<2x32x1xf32>
    %70 = vector.broadcast %69 : vector<2x32x1xf32> to vector<2x32x32xf32>
    %71 = arith.mulf %66, %70 : vector<2x32x32xf32>
    %72 = arith.truncf %71 : vector<2x32x32xf32> to vector<2x32x32xbf16>
    %cst_19 = arith.constant dense<0.000000e+00> : vector<2x32x16xf32>
    %73 = tpu.matmul %72, %56, %cst_19 {dimension_numbers = #tpu.dot_dimension_numbers<[2], [1], [1], [2], [0, 0, 0, 1, 1, 2], [0], [0]>} : vector<2x32x32xbf16>, vector<2x32x16xbf16>, vector<2x32x16xf32> -> vector<2x32x16xf32>
    %74 = vector.extract_strided_slice %47 {offsets = [0, 0, 16], sizes = [2, 32, 16], strides = [1, 1, 1]} : vector<2x32x96xbf16> to vector<2x32x16xbf16>
    %75 = vector.extract_strided_slice %47 {offsets = [0, 0, 48], sizes = [2, 32, 16], strides = [1, 1, 1]} : vector<2x32x96xbf16> to vector<2x32x16xbf16>
    %76 = vector.extract_strided_slice %47 {offsets = [0, 0, 80], sizes = [2, 32, 16], strides = [1, 1, 1]} : vector<2x32x96xbf16> to vector<2x32x16xbf16>
    %cst_20 = arith.constant dense<0.000000e+00> : vector<2x32x32xf32>
    %77 = tpu.matmul %74, %75, %cst_20 {dimension_numbers = #tpu.dot_dimension_numbers<[2], [2], [1], [1], [0, 0, 0, 1, 1, 1], [0], [0]>} : vector<2x32x16xbf16>, vector<2x32x16xbf16>, vector<2x32x32xf32> -> vector<2x32x32xf32>
    %cst_21 = arith.constant 2.500000e-01 : f32
    %78 = vector.broadcast %cst_21 : f32 to vector<2x32x32xf32>
    %79 = arith.mulf %77, %78 : vector<2x32x32xf32>
    %80 = vector.broadcast %53 : vector<1x32x32xf32> to vector<2x32x32xf32>
    %81 = arith.addf %79, %80 : vector<2x32x32xf32>
    %cst_22 = arith.constant dense<0xFF800000> : vector<2x32xf32>
    %82 = vector.multi_reduction <maximumf>, %81, %cst_22 [2] : vector<2x32x32xf32> to vector<2x32xf32>
    %83 = vector.shape_cast %82 : vector<2x32xf32> to vector<2x32x1xf32>
    %84 = vector.broadcast %83 : vector<2x32x1xf32> to vector<2x32x32xf32>
    %85 = arith.subf %81, %84 : vector<2x32x32xf32>
    %86 = math.exp %85 : vector<2x32x32xf32>
    %cst_23 = arith.constant dense<0.000000e+00> : vector<2x32xf32>
    %87 = vector.multi_reduction <add>, %86, %cst_23 [2] : vector<2x32x32xf32> to vector<2x32xf32>
    %88 = vector.shape_cast %87 : vector<2x32xf32> to vector<2x32x1xf32>
    %89 = tpu.reciprocal %88 : vector<2x32x1xf32> -> vector<2x32x1xf32>
    %90 = vector.broadcast %89 : vector<2x32x1xf32> to vector<2x32x32xf32>
    %91 = arith.mulf %86, %90 : vector<2x32x32xf32>
    %92 = arith.truncf %91 : vector<2x32x32xf32> to vector<2x32x32xbf16>
    %cst_24 = arith.constant dense<0.000000e+00> : vector<2x32x16xf32>
    %93 = tpu.matmul %92, %76, %cst_24 {dimension_numbers = #tpu.dot_dimension_numbers<[2], [1], [1], [2], [0, 0, 0, 1, 1, 2], [0], [0]>} : vector<2x32x32xbf16>, vector<2x32x16xbf16>, vector<2x32x16xf32> -> vector<2x32x16xf32>
    %94 = tpu.concatenate %73, %93 in 2 : vector<2x32x16xf32>, vector<2x32x16xf32> -> vector<2x32x32xf32>
    %95 = vector.shape_cast %94 : vector<2x32x32xf32> to vector<64x32xf32>
    %96 = arith.truncf %95 : vector<64x32xf32> to vector<64x32xbf16>
    %cst_25 = arith.constant dense<0.000000e+00> : vector<64x32xf32>
    %97 = tpu.matmul %96, %17, %cst_25 {dimension_numbers = #tpu.dot_dimension_numbers<[1], [0], [0], [1], [0, 0, 1, 1], [], []>} : vector<64x32xbf16>, vector<32x32xbf16>, vector<64x32xf32> -> vector<64x32xf32>
    %98 = arith.addf %3, %97 : vector<64x32xf32>
    %99 = vector.broadcast %9 : vector<1x32xf32> to vector<64x32xf32>
    %100 = arith.addf %98, %99 : vector<64x32xf32>
    %cst_26 = arith.constant dense<0.000000e+00> : vector<64xf32>
    %101 = vector.multi_reduction <add>, %100, %cst_26 [1] : vector<64x32xf32> to vector<64xf32>
    %102 = vector.shape_cast %101 : vector<64xf32> to vector<64x1xf32>
    %cst_27 = arith.constant 3.200000e+01 : f32
    %103 = vector.broadcast %cst_27 : f32 to vector<64x1xf32>
    %104 = arith.divf %102, %103 : vector<64x1xf32>
    %105 = vector.broadcast %104 : vector<64x1xf32> to vector<64x32xf32>
    %106 = arith.subf %100, %105 : vector<64x32xf32>
    %107 = arith.mulf %106, %106 : vector<64x32xf32>
    %cst_28 = arith.constant dense<0.000000e+00> : vector<64xf32>
    %108 = vector.multi_reduction <add>, %107, %cst_28 [1] : vector<64x32xf32> to vector<64xf32>
    %109 = vector.shape_cast %108 : vector<64xf32> to vector<64x1xf32>
    %cst_29 = arith.constant 3.200000e+01 : f32
    %110 = vector.broadcast %cst_29 : f32 to vector<64x1xf32>
    %111 = arith.divf %109, %110 : vector<64x1xf32>
    %112 = vector.broadcast %104 : vector<64x1xf32> to vector<64x32xf32>
    %113 = arith.subf %100, %112 : vector<64x32xf32>
    %cst_30 = arith.constant 9.99999996E-13 : f32
    %114 = vector.broadcast %cst_30 : f32 to vector<64x1xf32>
    %115 = arith.addf %111, %114 : vector<64x1xf32>
    %116 = math.rsqrt %115 : vector<64x1xf32>
    %117 = vector.broadcast %116 : vector<64x1xf32> to vector<64x32xf32>
    %118 = arith.mulf %113, %117 : vector<64x32xf32>
    %119 = vector.broadcast %10 : vector<1x32xf32> to vector<64x32xf32>
    %120 = arith.mulf %118, %119 : vector<64x32xf32>
    %121 = vector.broadcast %11 : vector<1x32xf32> to vector<64x32xf32>
    %122 = arith.addf %120, %121 : vector<64x32xf32>
    %123 = arith.truncf %122 : vector<64x32xf32> to vector<64x32xbf16>
    %cst_31 = arith.constant dense<0.000000e+00> : vector<64x128xf32>
    %124 = tpu.matmul %123, %18, %cst_31 {dimension_numbers = #tpu.dot_dimension_numbers<[1], [0], [0], [1], [0, 0, 1, 1], [], []>} : vector<64x32xbf16>, vector<32x128xbf16>, vector<64x128xf32> -> vector<64x128xf32>
    %125 = vector.broadcast %12 : vector<1x128xf32> to vector<64x128xf32>
    %126 = arith.addf %124, %125 : vector<64x128xf32>
    %cst_32 = arith.constant 5.000000e-01 : f32
    %127 = vector.broadcast %cst_32 : f32 to vector<64x128xf32>
    %128 = arith.mulf %127, %126 : vector<64x128xf32>
    %129 = arith.mulf %126, %126 : vector<64x128xf32>
    %130 = arith.mulf %129, %126 : vector<64x128xf32>
    %cst_33 = arith.constant 4.471500e-02 : f32
    %131 = vector.broadcast %cst_33 : f32 to vector<64x128xf32>
    %132 = arith.mulf %131, %130 : vector<64x128xf32>
    %133 = arith.addf %126, %132 : vector<64x128xf32>
    %cst_34 = arith.constant 0.797884583 : f32
    %134 = vector.broadcast %cst_34 : f32 to vector<64x128xf32>
    %135 = arith.mulf %134, %133 : vector<64x128xf32>
    %136 = math.tanh %135 : vector<64x128xf32>
    %cst_35 = arith.constant 1.000000e+00 : f32
    %137 = vector.broadcast %cst_35 : f32 to vector<64x128xf32>
    %138 = arith.addf %137, %136 : vector<64x128xf32>
    %139 = arith.mulf %128, %138 : vector<64x128xf32>
    %140 = arith.truncf %139 : vector<64x128xf32> to vector<64x128xbf16>
    %cst_36 = arith.constant dense<0.000000e+00> : vector<64x32xf32>
    %141 = tpu.matmul %140, %19, %cst_36 {dimension_numbers = #tpu.dot_dimension_numbers<[1], [1], [0], [0], [0, 0, 1, 0], [], []>} : vector<64x128xbf16>, vector<32x128xbf16>, vector<64x32xf32> -> vector<64x32xf32>
    %142 = arith.addf %100, %141 : vector<64x32xf32>
    %143 = vector.broadcast %13 : vector<1x32xf32> to vector<64x32xf32>
    %144 = arith.addf %142, %143 : vector<64x32xf32>
    %c0_37 = arith.constant 0 : index
    %c0_38 = arith.constant 0 : index
    %145 = vector.load %arg10[%c0_37, %c0_38] : memref<64x32xf32, #tpu.memory_space<vmem>>, vector<64x32xf32>
    tpu.vector_store %arg10[%c0_37, %c0_38], %144 {strides = array<i32>} : memref<64x32xf32, #tpu.memory_space<vmem>>, vector<64x32xf32>,
    %c1_i32 = arith.constant 1 : i32
    %146 = arith.cmpi eq, %arg1, %c1_i32 : i32
    %147 = arith.extui %146 : i1 to i32
    %c0_i32_39 = arith.constant 0 : i32
    %148 = arith.cmpi ne, %147, %c0_i32_39 : i32
    scf.if %148 {
      %c0_40 = arith.constant 0 : index
      %c0_41 = arith.constant 0 : index
      %149 = vector.load %arg7[%c0_40, %c0_41] : memref<8x128xf32, #tpu.memory_space<vmem>>, vector<1x32xf32>
      %c1 = arith.constant 1 : index
      %c0_42 = arith.constant 0 : index
      %150 = vector.load %arg7[%c1, %c0_42] : memref<8x128xf32, #tpu.memory_space<vmem>>, vector<1x32xf32>
      %c2 = arith.constant 2 : index
      %c0_43 = arith.constant 0 : index
      %151 = vector.load %arg7[%c2, %c0_43] : memref<8x128xf32, #tpu.memory_space<vmem>>, vector<1x128xf32>
      %152 = vector.shape_cast %144 : vector<64x32xf32> to vector<2x32x32xf32>
      %153 = vector.extract_strided_slice %152 {offsets = [0, 0, 0], sizes = [2, 1, 32], strides = [1, 1, 1]} : vector<2x32x32xf32> to vector<2x1x32xf32>
      %154 = vector.shape_cast %153 : vector<2x1x32xf32> to vector<2x32xf32>
      %cst_44 = arith.constant dense<0.000000e+00> : vector<2xf32>
      %155 = vector.multi_reduction <add>, %154, %cst_44 [1] : vector<2x32xf32> to vector<2xf32>
      %156 = vector.shape_cast %155 : vector<2xf32> to vector<2x1xf32>
      %cst_45 = arith.constant 3.200000e+01 : f32
      %157 = vector.broadcast %cst_45 : f32 to vector<2x1xf32>
      %158 = arith.divf %156, %157 : vector<2x1xf32>
      %159 = vector.broadcast %158 : vector<2x1xf32> to vector<2x32xf32>
      %160 = arith.subf %154, %159 : vector<2x32xf32>
      %161 = arith.mulf %160, %160 : vector<2x32xf32>
      %cst_46 = arith.constant dense<0.000000e+00> : vector<2xf32>
      %162 = vector.multi_reduction <add>, %161, %cst_46 [1] : vector<2x32xf32> to vector<2xf32>
      %163 = vector.shape_cast %162 : vector<2xf32> to vector<2x1xf32>
      %cst_47 = arith.constant 3.200000e+01 : f32
      %164 = vector.broadcast %cst_47 : f32 to vector<2x1xf32>
      %165 = arith.divf %163, %164 : vector<2x1xf32>
      %166 = vector.broadcast %158 : vector<2x1xf32> to vector<2x32xf32>
      %167 = arith.subf %154, %166 : vector<2x32xf32>
      %cst_48 = arith.constant 9.99999996E-13 : f32
      %168 = vector.broadcast %cst_48 : f32 to vector<2x1xf32>
      %169 = arith.addf %165, %168 : vector<2x1xf32>
      %170 = math.rsqrt %169 : vector<2x1xf32>
      %171 = vector.broadcast %170 : vector<2x1xf32> to vector<2x32xf32>
      %172 = arith.mulf %167, %171 : vector<2x32xf32>
      %173 = vector.broadcast %149 : vector<1x32xf32> to vector<2x32xf32>
      %174 = arith.mulf %172, %173 : vector<2x32xf32>
      %175 = vector.broadcast %150 : vector<1x32xf32> to vector<2x32xf32>
      %176 = arith.addf %174, %175 : vector<2x32xf32>
      %177 = arith.truncf %176 : vector<2x32xf32> to vector<2x32xbf16>
      %c0_49 = arith.constant 0 : index
      %c0_50 = arith.constant 0 : index
      %178 = vector.load %arg8[%c0_49, %c0_50] : memref<32x128xbf16, #tpu.memory_space<vmem>>, vector<32x128xbf16>
      %cst_51 = arith.constant dense<0.000000e+00> : vector<2x128xf32>
      %179 = tpu.matmul %177, %178, %cst_51 {dimension_numbers = #tpu.dot_dimension_numbers<[1], [0], [0], [1], [0, 0, 1, 1], [], []>} : vector<2x32xbf16>, vector<32x128xbf16>, vector<2x128xf32> -> vector<2x128xf32>
      %180 = vector.broadcast %151 : vector<1x128xf32> to vector<2x128xf32>
      %181 = arith.addf %179, %180 : vector<2x128xf32>
      %c0_52 = arith.constant 0 : index
      %c0_53 = arith.constant 0 : index
      %c0_54 = arith.constant 0 : index
      %182 = vector.load %arg9[%c0_52, %c0_53, %c0_54] : memref<1x2x128xf32, #tpu.memory_space<vmem>>, vector<1x2x128xf32>
      %183 = vector.shape_cast %182 : vector<1x2x128xf32> to vector<2x128xf32>
      %184 = vector.shape_cast %181 : vector<2x128xf32> to vector<1x2x128xf32>
      tpu.vector_store %arg9[%c0_52, %c0_53, %c0_54], %184 {strides = array<i32>} : memref<1x2x128xf32, #tpu.memory_space<vmem>>, vector<1x2x128xf32>,
    } else {
    }
    return
  }
  func.func @transform_0(%arg0: i32, %arg1: i32) -> (i32, i32) {
    %c0_i32 = arith.constant 0 : i32
    %c0_i32_0 = arith.constant 0 : i32
    return %arg0, %c0_i32 : i32, i32
  }
  func.func @transform_1(%arg0: i32, %arg1: i32) -> (i32, i32) {
    %c0_i32 = arith.constant 0 : i32
    %c0_i32_0 = arith.constant 0 : i32
    %c0_i32_1 = arith.constant 0 : i32
    return %c0_i32, %c0_i32_0 : i32, i32
  }
  func.func @transform_2(%arg0: i32, %arg1: i32) -> (i32, i32) {
    %c0_i32 = arith.constant 0 : i32
    %c0_i32_0 = arith.constant 0 : i32
    %c0_i32_1 = arith.constant 0 : i32
    return %c0_i32, %c0_i32_0 : i32, i32
  }
  func.func @transform_3(%arg0: i32, %arg1: i32) -> (i32, i32, i32) {
    %c0_i32 = arith.constant 0 : i32
    %c0_i32_0 = arith.constant 0 : i32
    %c0_i32_1 = arith.constant 0 : i32
    return %arg1, %c0_i32, %c0_i32_0 : i32, i32, i32
  }
  func.func @transform_4(%arg0: i32, %arg1: i32) -> (i32, i32, i32) {
    %c0_i32 = arith.constant 0 : i32
    %c0_i32_0 = arith.constant 0 : i32
    %c0_i32_1 = arith.constant 0 : i32
    return %arg1, %c0_i32, %c0_i32_0 : i32, i32, i32
  }
  func.func @transform_5(%arg0: i32, %arg1: i32) -> (i32, i32) {
    %c0_i32 = arith.constant 0 : i32
    %c0_i32_0 = arith.constant 0 : i32
    %c0_i32_1 = arith.constant 0 : i32
    return %c0_i32, %c0_i32_0 : i32, i32
  }
  func.func @transform_6(%arg0: i32, %arg1: i32) -> (i32, i32) {
    %c0_i32 = arith.constant 0 : i32
    %c0_i32_0 = arith.constant 0 : i32
    %c0_i32_1 = arith.constant 0 : i32
    return %c0_i32, %c0_i32_0 : i32, i32
  }
  func.func @transform_7(%arg0: i32, %arg1: i32) -> (i32, i32, i32) {
    %c0_i32 = arith.constant 0 : i32
    %c0_i32_0 = arith.constant 0 : i32
    %c0_i32_1 = arith.constant 0 : i32
    return %arg0, %c0_i32, %c0_i32_0 : i32, i32, i32
  }
}

</mosaic_0001>

<bundles_post_ra>
// kernel: tpu_custom_call.1
= control target key start
LH: loop header
LB: loop body
LE: loop exit
PB: predicated region body
PF: predicated region fallthrough
CT: control target
= control target key end

     0   :  { %6 = vsyncpa [#allocation3], 0  ;;  %s105_s0 = inlined_call_operand.hbm [shape: f32[8,128], index: 0, kind: input, shape index: {}]   ;;  %s106_s1 = inlined_call_operand.hbm [shape: f32[8,128], index: 1, kind: output, shape index: {}]  }
   0x1   :  { %7 = vsyncpa [#allocation4], 0  ;;  %s87_s6 = smov [#allocation2]  }
   0x2   :  { %s14_s7 = sshll.u32 %s87_s6, 4  ;;  %s15_s7 = int_to_ptr.vmem [resolvable:$true] %s14_s7 }
   0x3   :  { %s51_s8 = scalar_lea.vmem %s15_s7, 128  ;;  %p56_p1 = scmp.lt.s32.totalorder %s15_s7, %s15_s7 }
   0x4   :  { %p52_p0 = scmp.ne.s32.totalorder %s15_s7, %s51_s8  ;;  %p57_p2 = scmp.lt.s32.totalorder %s51_s8, %s51_s8 }
   0x6   :  { %p58_p3 = por %p57_p2, %p56_p1 }
   0x8   :  { %p59_p4 = pnand %p58_p3, %p52_p0 }
   0xa   :  { %62 = shalt.err (!%p59_p4)
}
   0xb   :  { %17 = dma.hbm_to_vmem [thread:$0]  %s105_s0, 128, %s15_s7, [#allocation3]  }
   0xc   :  { %83 = dma.done.wait [#allocation3], 128  }
   0xd   :  { %84 = vsyncadd [#allocation3], 4294967168  ;;  %v21_v0 = vld [vmem:[#allocation2] sm:$0xff]  ;;  %s88_s11 = smov [#allocation5]  }
   0xe   :  { %41 = verf.f32 %v21_v0  ;;  %s30_s12 = sshll.u32 %s88_s11, 4  ;;  %s31_s12 = int_to_ptr.vmem [resolvable:$true] %s30_s12 }
   0xf   :  { %s63_s13 = scalar_lea.vmem %s31_s12, 128  ;;  %p68_p6 = scmp.lt.s32.totalorder %s31_s12, %s31_s12 }
  0x10   :  { %p64_p5 = scmp.ne.s32.totalorder %s31_s12, %s63_s13  ;;  %p69_p7 = scmp.lt.s32.totalorder %s63_s13, %s63_s13 }
  0x12   :  { %p70_p8 = por %p69_p7, %p68_p6 }
  0x14   :  { %p71_p9 = pnand %p70_p8, %p64_p5 }
  0x1b   :  { %v42_v1 = vpop.eup %41 }
  0x1c   :  { %23 = vst [vmem:[#allocation5] sm:$0xff] %v42_v1 }
  0x1d   :  { %74 = shalt.err (!%p71_p9)
}
  0x1e   :  { %33 = dma.vmem_to_hbm [thread:$0]  %s31_s12, 128, %s106_s1, [#allocation4]  }
  0x1f   :  { %85 = dma.done.wait [#allocation4], 128  }
  0x20   :  { %86 = vsyncadd [#allocation4], 4294967168 }
  0x21   :  { %37 = vsyncpa [#allocation3], 1 }
  0x22   :  { %38 = vsyncpa [#allocation4], 1 }

// kernel: mul.9
= control target key start
LH: loop header
LB: loop body
LE: loop exit
PB: predicated region body
PF: predicated region fallthrough
CT: control target
= control target key end

     0   :  { %vm9_vm0 = vcmask 523264   ;;  %s26_s8 = smov 64   ;;  %vm15_vm1 = vcmask 1048064   ;;  %s43_s0 = inlined_call_operand.vmem [shape: f32[3,64], index: 0, kind: input, shape index: {}]   ;;  %s44_s1 = inlined_call_operand.vmem [shape: f32[192], index: 1, kind: output, shape index: {}]  }
   0x1   :  { %v5_v0 = vld [vmem:[%s43_s0] sm:$0xf]  ;;  %s7_s0 = smov 3 }
   0x2   :  { %6 = vst [vmem:[#allocation1] sm:$0xf] %v5_v0 }
   0x9   :  { %v12_v1 = vld [vmem:[#allocation1 + $0x1] sm:$0x1]   ;;  %v8_v2 = vld [vmem:[#allocation1] ss:$2 sm:%s7_s0]  }
   0xa   :  { %13 = vrot.lane.b32.xlu0 %v12_v1, %s26_s8  ;;  %10 = vst.msk [vmem:[#allocation0] sm:$0x3] %vm9_vm0, %v8_v2  }
  0x7c   :  { %v14_v3 = vpop.permute.xlu0 %13  }
  0x7d   :  { %16 = vst.msk [vmem:[#allocation0] sm:$0x1] %vm15_vm1, %v14_v3  }
  0x84   :  { %v21_v4 = vld [vmem:[#allocation0] sm:$0x3] }
  0x85   :  { %24 = vst [vmem:[%s44_s1] sm:$0x3] %v21_v4 }

// kernel: sub.37
= control target key start
LH: loop header
LB: loop body
LE: loop exit
PB: predicated region body
PF: predicated region fallthrough
CT: control target
= control target key end

     0   :  { %s34_s0 = inlined_call_operand.vmem [shape: f32[32], index: 0, kind: input, shape index: {}]   ;;  %s35_s1 = inlined_call_operand.vmem [shape: f32[32], index: 1, kind: input, shape index: {}]   ;;  %s36_s2 = inlined_call_operand.vmem [shape: f32[32], index: 2, kind: output, shape index: {}]  }
   0x1   :  { %v3_v0 = vld [vmem:[%s34_s0] sm:$0x1] }
   0x2   :  { %v4_v1 = vld [vmem:[%s35_s1] sm:$0x1] }
   0x3   :  { %v7_v2 = vsub.f32 %v3_v0, %v4_v1 }
   0x5   :  { %9 = vst [vmem:[%s36_s2] sm:$0x1] %v7_v2 }

// kernel: shadow_aesthetic_score.1
= control target key start
LH: loop header
LB: loop body
LE: loop exit
PB: predicated region body
PF: predicated region fallthrough
CT: control target
= control target key end

     0   :  { %12 = vsyncpa [#allocation4], 0  ;;  %s2930_s24 = smov 0   ;;  %s2932_s25 = smov 0   ;;  %s3500_s0 = inlined_call_operand.vmem [shape: bf16[64,192], index: 0, kind: input, shape index: {}]   ;;  %s3501_s1 = inlined_call_operand.vmem [shape: bf16[192,32], index: 1, kind: input, shape index: {}]   ;;  %s3502_s2 = inlined_call_operand.vmem [shape: f32[64,32], index: 2, kind: input, shape index: {}]   ;;  %s3503_s3 = inlined_call_operand.vmem [shape: f32[2,8,128], index: 3, kind: input, shape index: {}]   ;;  %s3504_s4 = inlined_call_operand.vmem [shape: bf16[2,96,128], index: 4, kind: input, shape index: {}]   ;;  %s3505_s5 = inlined_call_operand.vmem [shape: f32[8,128], index: 5, kind: input, shape index: {}]   ;;  %s3506_s6 = inlined_call_operand.vmem [shape: bf16[32,128], index: 6, kind: input, shape index: {}]   ;;  %s3507_s7 = inlined_call_operand.hbm [shape: f32[1,2,128], index: 7, kind: output, shape index: {}]  }
   0x1   :  { %s2934_s26 = smov 0  }
   0x2 LB: > { %s2320_s27 = sadd.s32 4294967295, %s2876_s26   ;;  %s27_s28 = sadd.s32 1, %s2872_s25  ;;  %s2876_s26 = sphi %s2934_s26, %s18_s26   ;;  %s2872_s25 = sphi %s2932_s25, %s3510_s25   ;;  %s2868_s24 = sphi %s2930_s24, %s3509_s24  }
   0x3   : > { %p28_p0 = scmp.ge.s32.totalorder %s27_s28, 2  ;;  %p2324_p1 = scmp.ge.s32.totalorder %s2876_s26, 1 }
   0x4   : > { %p271_p2 = scmp.lt.s32.totalorder %s2876_s26, 3 }
   0x5   : > { %s3512_s28 = smov (%p28_p0, %s27_s28), 0 }
   0x6   : > { %p272_p3 = pnand %p2324_p1, %p271_p2 }
   0x7   : > { %p315_p4 = scmp.lt.s32.totalorder (!%p272_p3), %s2868_s24, 1  ;;  %p2327_p5 = scmp.ne.s32.totalorder (!%p272_p3), %s2868_s24, 0 }
   0x8   : > { %275 = sbr.rel (%p272_p3) target bundleno = 3872 (0xf20), region = 48 }
   0xd   : > { %s316_s29 = scalar_select %p315_p4, %s2868_s24, 1 }
   0xe   : > { %328 = sbr.rel (%p2327_p5) target bundleno = 276 (0x114), region = 52 }
   0xf   : > { %s2325_s30 = sshll.u32 %s316_s29, 3  ;;  %s2608_s8 = smul.u32 48, %s316_s29 }
  0x10   : > { %s2956_s11 = scalar_lea.vmem %s3503_s3, %s2325_s30 }
  0x11   : > { %s2961_s14 = scalar_lea.vmem %s3504_s4, %s2608_s8 }
  0x13   : > { %v2651_v0 = vld [vmem:[%s3501_s1 + $0x38] sm:$0xff]   ;;  %v2878_v1 = vmov 0   ;;  %v2652_v2 = vld [vmem:[%s3501_s1 + $0x30] sm:$0xff]   ;;  %v2653_v3 = vld [vmem:[%s3501_s1 + $0x28] sm:$0xff]   ;;  %vm477_vm0 = vcmask 523264   ;;  %vm555_vm1 = vcmask 261120  }
  0x14   : > { %490 = vmatprep.subr.bf16.mxu0 %v2878_v1  ;;  %2576 = vmatprep.subr.bf16.mxu1 %v2878_v1  ;;  %v2654_v4 = vld [vmem:[%s3501_s1 + $0x20] sm:$0xff]   ;;  %v2655_v6 = vld [vmem:[%s3501_s1 + $0x18] sm:$0xff]   ;;  %v2656_v8 = vld [vmem:[%s3501_s1 + $0x10] sm:$0xff]  }
  0x15   : > { %491 = vmatpush1.bf16.msra.mxu0 %v2651_v0  ;;  %2588 = vmatpush1.bf16.msra.mxu1 %v2651_v0  ;;  %v2665_v5 = vld [vmem:[%s3500_s0 + $0x4] ss:$8 sps:$4 sm:$0xff]   ;;  %v2659_v11 = vld [vmem:[%s3501_s1 + $0x58] sm:$0xff]   ;;  %v2660_v12 = vld [vmem:[%s3501_s1 + $0x50] sm:$0xff]  }
  0x16   : > { %492 = vmatprep.subr.bf16.mxu0 %v2878_v1  ;;  %2577 = vmatprep.subr.bf16.mxu1 %v2878_v1  ;;  %v2668_v7 = vld [vmem:[%s3500_s0 + $0x24] ss:$8 sps:$4 sm:$0xff]   ;;  %v2663_v15 = vld [vmem:[%s3500_s0] ss:$8 sps:$4 sm:$0xff]   ;;  %v2669_v17 = vld [vmem:[%s3500_s0 + $0x14] ss:$8 sps:$4 sm:$0xff]  }
  0x17   : > { %2348 = vmatprep.mubr.msk.bf16.mxu0 %vm477_vm0, %v2665_v5  ;;  %2350 = vmatprep.mubr.msk.bf16.mxu1 %vm477_vm0, %v2668_v7  ;;  %v2657_v9 = vld [vmem:[%s3501_s1 + $0x8] sm:$0xff]   ;;  %v2658_v10 = vld [vmem:[%s3501_s1] sm:$0xff]   ;;  %v2671_v18 = vld [vmem:[%s3500_s0 + $0x34] ss:$8 sps:$4 sm:$0xff]  }
  0x18   : > { %v2661_v13 = vld [vmem:[%s3501_s1 + $0x48] sm:$0xff]   ;;  %v2662_v14 = vld [vmem:[%s3501_s1 + $0x40] sm:$0xff]   ;;  %v2673_v19 = vld [vmem:[%s3500_s0 + $0x10] ss:$8 sps:$4 sm:$0xff]  }
  0x19   : > { %493 = vmatpush1.bf16.msra.mxu0 %v2652_v2  ;;  %2589 = vmatpush1.bf16.msra.mxu1 %v2652_v2  ;;  %v2666_v16 = vld [vmem:[%s3500_s0 + $0x20] ss:$8 sps:$4 sm:$0xff]   ;;  %v2674_v20 = vld [vmem:[%s3500_s0 + $0x30] ss:$8 sps:$4 sm:$0xff]  }
  0x1a   : > { %494 = vmatprep.subr.bf16.mxu0 %v2878_v1  ;;  %2578 = vmatprep.subr.bf16.mxu1 %v2878_v1  ;;  %v361_v21 = vld [vmem:[%s3502_s2] sm:$0xff]  ;;  %v362_v29 = vld [vmem:[%s3502_s2 + $0x8] sm:$0xff]  ;;  %v363_v37 = vld [vmem:[%s3502_s2 + $0x10] sm:$0xff] }
  0x1b   : > { %v365_v22 = vld [vmem:[%s3502_s2 + $0x20] sm:$0xff]  ;;  %v366_v30 = vld [vmem:[%s3502_s2 + $0x28] sm:$0xff]  ;;  %v367_v38 = vld [vmem:[%s3502_s2 + $0x30] sm:$0xff] }
  0x1c   : > { %v364_v45 = vld [vmem:[%s3502_s2 + $0x18] sm:$0xff] }
  0x1d   : > { %495 = vmatpush1.bf16.msra.mxu0 %v2653_v3  ;;  %2590 = vmatpush1.bf16.msra.mxu1 %v2653_v3  ;;  %v368_v46 = vld [vmem:[%s3502_s2 + $0x38] sm:$0xff] }
  0x1e   : > { %496 = vmatprep.subr.bf16.mxu0 %v2878_v1  ;;  %2579 = vmatprep.subr.bf16.mxu1 %v2878_v1 }
  0x21   : > { %497 = vmatpush1.bf16.msra.mxu0 %v2654_v4  ;;  %2591 = vmatpush1.bf16.msra.mxu1 %v2654_v4 }
  0x22   : > { %498 = vmatprep.subr.bf16.mxu0 %v2878_v1  ;;  %2580 = vmatprep.subr.bf16.mxu1 %v2878_v1 }
  0x25   : > { %499 = vmatpush1.bf16.msra.mxu0 %v2655_v6  ;;  %2592 = vmatpush1.bf16.msra.mxu1 %v2655_v6 }
  0x26   : > { %500 = vmatprep.subr.bf16.mxu0 %v2878_v1  ;;  %2581 = vmatprep.subr.bf16.mxu1 %v2878_v1 }
  0x29   : > { %501 = vmatpush1.bf16.msra.mxu0 %v2656_v8  ;;  %2593 = vmatpush1.bf16.msra.mxu1 %v2656_v8 }
  0x2a   : > { %502 = vmatprep.subr.bf16.mxu0 %v2878_v1  ;;  %2582 = vmatprep.subr.bf16.mxu1 %v2878_v1 }
  0x2d   : > { %503 = vmatpush1.bf16.msra.mxu0 %v2657_v9  ;;  %2594 = vmatpush1.bf16.msra.mxu1 %v2657_v9 }
  0x2e   : > { %504 = vmatprep.subr.bf16.mxu0 %v2878_v1  ;;  %2583 = vmatprep.subr.bf16.mxu1 %v2878_v1 }
  0x31   : > { %505 = vmatpush1.bf16.msra.mxu0 %v2658_v10  ;;  %2595 = vmatpush1.bf16.msra.mxu1 %v2658_v10 }
  0x32   : > { %514 = vmatprep.subr.bf16.mxu0 %v2878_v1  ;;  %2584 = vmatprep.subr.bf16.mxu1 %v2878_v1 }
  0x35   : > { %515 = vmatpush2.bf16.msra.mxu0 %v2659_v11  ;;  %2596 = vmatpush2.bf16.msra.mxu1 %v2659_v11 }
  0x36   : > { %516 = vmatprep.subr.bf16.mxu0 %v2878_v1  ;;  %2585 = vmatprep.subr.bf16.mxu1 %v2878_v1 }
  0x39   : > { %517 = vmatpush2.bf16.msra.mxu0 %v2660_v12  ;;  %2597 = vmatpush2.bf16.msra.mxu1 %v2660_v12 }
  0x3a   : > { %518 = vmatprep.subr.bf16.mxu0 %v2878_v1  ;;  %2586 = vmatprep.subr.bf16.mxu1 %v2878_v1 }
  0x3d   : > { %519 = vmatpush2.bf16.msra.mxu0 %v2661_v13  ;;  %2598 = vmatpush2.bf16.msra.mxu1 %v2661_v13 }
  0x3e   : > { %520 = vmatprep.subr.bf16.mxu0 %v2878_v1  ;;  %2587 = vmatprep.subr.bf16.mxu1 %v2878_v1 }
  0x41   : > { %521 = vmatpush2.bf16.msra.mxu0 %v2662_v14  ;;  %2599 = vmatpush2.bf16.msra.mxu1 %v2662_v14 }
  0x44   : > { %523 = vmatmul.mubr.bf16.vlgmr.msra.gmra.mxu0 %v2663_v15  ;;  %539 = vmatmul.mubr.bf16.vlgmr.msra.gmra.mxu1 %v2666_v16 }
  0x45   : > { %2349 = vmatprep.mubr.msk.bf16.mxu0 %vm477_vm0, %v2669_v17  ;;  %2351 = vmatprep.mubr.msk.bf16.mxu1 %vm477_vm0, %v2671_v18 }
  0x4c   : > { %531 = vmatmul.mubr.bf16.gmra.mxu0 %v2673_v19  ;;  %547 = vmatmul.mubr.bf16.gmra.mxu1 %v2674_v20 }
 0x104   : > { %v524_v23 = vpop.f32.mrf.mxu0  ;;  %v540_v24 = vpop.f32.mrf.mxu1 }
 0x105   : > { %v525_v25 = vadd.f32 %v524_v23, %v361_v21  ;;  %v541_v26 = vadd.f32 %v540_v24, %v365_v22 }
 0x106   : > { %v526_v27 = vpop.f32.mrf.mxu0  ;;  %v542_v28 = vpop.f32.mrf.mxu1 }
 0x107   : > { %556 = vst.msk [vmem:[#allocation2] sm:$0xff] %vm555_vm1, %v525_v25  ;;  %560 = vst.msk [vmem:[#allocation2 + $0x20] sm:$0xff] %vm555_vm1, %v541_v26 }
 0x108   : > { %v527_v31 = vpop.f32.mrf.mxu0  ;;  %v543_v32 = vpop.f32.mrf.mxu1 }
 0x109   : > { %v528_v33 = vadd.f32 %v527_v31, %v362_v29  ;;  %v544_v34 = vadd.f32 %v543_v32, %v366_v30 }
 0x10a   : > { %v529_v35 = vpop.f32.mrf.mxu0  ;;  %v545_v36 = vpop.f32.mrf.mxu1 }
 0x10b   : > { %557 = vst.msk [vmem:[#allocation2 + $0x8] sm:$0xff] %vm555_vm1, %v528_v33  ;;  %561 = vst.msk [vmem:[#allocation2 + $0x28] sm:$0xff] %vm555_vm1, %v544_v34 }
 0x10c   : > { %v532_v39 = vpop.f32.mrf.mxu0  ;;  %v548_v40 = vpop.f32.mrf.mxu1 }
 0x10d   : > { %v533_v41 = vadd.f32 %v532_v39, %v363_v37  ;;  %v549_v42 = vadd.f32 %v548_v40, %v367_v38 }
 0x10e   : > { %v534_v43 = vpop.f32.mrf.mxu0  ;;  %v550_v44 = vpop.f32.mrf.mxu1 }
 0x10f   : > { %558 = vst.msk [vmem:[#allocation2 + $0x10] sm:$0xff] %vm555_vm1, %v533_v41  ;;  %562 = vst.msk [vmem:[#allocation2 + $0x30] sm:$0xff] %vm555_vm1, %v549_v42 }
 0x110   : > { %v535_v47 = vpop.f32.mrf.mxu0  ;;  %v551_v48 = vpop.f32.mrf.mxu1 }
 0x111   : > { %v536_v49 = vadd.f32 %v535_v47, %v364_v45  ;;  %v552_v50 = vadd.f32 %v551_v48, %v368_v46 }
 0x112   : > { %v537_v51 = vpop.f32.mrf.mxu0  ;;  %v553_v52 = vpop.f32.mrf.mxu1 }
 0x113   : > { %559 = vst.msk [vmem:[#allocation2 + $0x18] sm:$0xff] %vm555_vm1, %v536_v49  ;;  %563 = vst.msk [vmem:[#allocation2 + $0x38] sm:$0xff] %vm555_vm1, %v552_v50 }
 0x114 PF: > { %v564_v53 = vld [vmem:[#allocation2] sm:$0xff]  ;;  %vm585_vm2 = vcmask 261120   ;;  %v565_v55 = vld [vmem:[#allocation2 + $0x8] sm:$0xff]  ;;  %vm826_vm3 = vcmask 130048   ;;  %s2879_s23 = smov 96   ;;  %s2881_s29 = smov 64  }
 0x115   : > { %v586_v56 = vsel %vm585_vm2, %v564_v53, 0.0  ;;  %v589_v59 = vsel %vm585_vm2, %v565_v55, 0.0  ;;  %v568_v60 = vld [vmem:[#allocation2 + $0x20] sm:$0xff]  ;;  %v569_v62 = vld [vmem:[#allocation2 + $0x28] sm:$0xff]  ;;  %s2882_s30 = smov 80   ;;  %s2883_s8 = smov 112  }
 0x116   : > { %v566_v54 = vld [vmem:[#allocation2 + $0x10] sm:$0xff]  ;;  %587 = vadd.xlane.f32.xlu0 %v586_v56  ;;  %v598_v63 = vsel %vm585_vm2, %v568_v60, 0.0  ;;  %v601_v0 = vsel %vm585_vm2, %v569_v62, 0.0  ;;  %v3109_v45 = vld [vmem:[%s2961_s14 + $0x8] sm:$0xff]   ;;  %v3112_v46 = vld [vmem:[%s2961_s14] sm:$0xff]   ;;  %v691_v56 = vlaneseq  ;;  %s2884_s9 = smov 48  }
 0x117   : > { %v592_v57 = vsel %vm585_vm2, %v566_v54, 0.0  ;;  %v570_v1 = vld [vmem:[#allocation2 + $0x30] sm:$0xff]  ;;  %2456 = vmatprep.subr.bf16.mxu0 %v3109_v45  ;;  %s2885_s10 = smov 32   ;;  %s2886_s12 = smov 16  }
 0x118   : > { %593 = vadd.xlane.f32.xlu1 %v592_v57  ;;  %v604_v3 = vsel %vm585_vm2, %v570_v1, 0.0  ;;  %2457 = vmatpush3.bf16.msra.mxu0 %v3109_v45  ;;  %p2386_p6 = scmp.ne.s32.totalorder %s2868_s24, 1 }
 0x119   : > { %2458 = vmatprep.subr.bf16.mxu0 %v3112_v46 }
 0x11a   : > { %v567_v58 = vld [vmem:[#allocation2 + $0x18] sm:$0xff]  ;;  %590 = vadd.xlane.f32.xlu0 %v589_v59 }
 0x11b   : > { %v595_v61 = vsel %vm585_vm2, %v567_v58, 0.0  ;;  %v571_v2 = vld [vmem:[#allocation2 + $0x38] sm:$0xff] }
 0x11c   : > { %596 = vadd.xlane.f32.xlu1 %v595_v61  ;;  %v607_v4 = vsel %vm585_vm2, %v571_v2, 0.0  ;;  %2459 = vmatpush3.bf16.msra.mxu0 %v3112_v46 }
 0x11e   : > { %599 = vadd.xlane.f32.xlu0 %v598_v63  ;;  %v3119_v63 = vshrl.u32 %v691_v56, 7 }
 0x120   : > { %602 = vadd.xlane.f32.xlu1 %v601_v0 }
 0x122   : > { %605 = vadd.xlane.f32.xlu0 %v604_v3 }
 0x124   : > { %608 = vadd.xlane.f32.xlu1 %v607_v4 }
 0x19f   : > { %v588_v5 = vpop.xlane.xlu0 %587 }
 0x1a0   : > { %v611_v7 = vmul.f32 0.03125, %v588_v5 }
 0x1a1   : > { %v594_v6 = vpop.xlane.xlu1 %593 }
 0x1a2   : > { %v613_v8 = vmul.f32 0.03125, %v594_v6  ;;  %v3068_v9 = vsub.f32 %v564_v53, %v611_v7  ;;  %v693_v6 = vsub.s32 0, %v3119_v63 }
 0x1a3   : > { %v591_v11 = vpop.xlane.xlu0 %590 }
 0x1a4   : > { %v3070_v10 = vsub.f32 %v566_v54, %v613_v8  ;;  %v612_v13 = vmul.f32 0.03125, %v591_v11  ;;  %v627_v15 = vmul.f32 %v3068_v9, %v3068_v9  ;;  %v3123_v8 = vld [vmem:[%s2956_s11] sm:$0xff] }
 0x1a5   : > { %v597_v12 = vpop.xlane.xlu1 %596 }
 0x1a6   : > { %v614_v14 = vmul.f32 0.03125, %v597_v12  ;;  %v629_v16 = vmul.f32 %v3070_v10, %v3070_v10  ;;  %v3076_v17 = vsub.f32 %v565_v55, %v612_v13  ;;  %v635_v19 = vsel %vm585_vm2, %v627_v15, 0.0 }
 0x1a7   : > { %636 = vadd.xlane.f32.xlu0 %v635_v19  ;;  %v600_v20 = vpop.xlane.xlu0 %599  ;;  %v694_v15 = vrot.slane %v3123_v8, %v693_v6 }
 0x1a8   : > { %v3078_v18 = vsub.f32 %v567_v58, %v614_v14  ;;  %v641_v22 = vsel %vm585_vm2, %v629_v16, 0.0  ;;  %v615_v23 = vmul.f32 0.03125, %v600_v20  ;;  %v628_v25 = vmul.f32 %v3076_v17, %v3076_v17 }
 0x1a9   : > { %v603_v21 = vpop.xlane.xlu1 %602  ;;  %v705_v16 = vsub.s32 1, %v3119_v63 }
 0x1aa   : > { %v616_v24 = vmul.f32 0.03125, %v603_v21  ;;  %v630_v26 = vmul.f32 %v3078_v18, %v3078_v18  ;;  %v3086_v27 = vsub.f32 %v568_v60, %v615_v23  ;;  %v638_v29 = vsel %vm585_vm2, %v628_v25, 0.0 }
 0x1ab   : > { %642 = vadd.xlane.f32.xlu0 %v641_v22  ;;  %639 = vadd.xlane.f32.xlu1 %v638_v29  ;;  %v606_v30 = vpop.xlane.xlu0 %605  ;;  %v706_v23 = vrot.slane %v3123_v8, %v705_v16 }
 0x1ac   : > { %v3088_v28 = vsub.f32 %v569_v62, %v616_v24  ;;  %v644_v32 = vsel %vm585_vm2, %v630_v26, 0.0  ;;  %v617_v33 = vmul.f32 0.03125, %v606_v30  ;;  %v631_v35 = vmul.f32 %v3086_v27, %v3086_v27 }
 0x1ad   : > { %v609_v31 = vpop.xlane.xlu1 %608 }
 0x1ae   : > { %v618_v34 = vmul.f32 0.03125, %v609_v31  ;;  %v632_v36 = vmul.f32 %v3088_v28, %v3088_v28  ;;  %v3096_v37 = vsub.f32 %v570_v1, %v617_v33  ;;  %v647_v39 = vsel %vm585_vm2, %v631_v35, 0.0 }
 0x1af   : > { %645 = vadd.xlane.f32.xlu1 %v644_v32  ;;  %648 = vadd.xlane.f32.xlu0 %v647_v39 }
 0x1b0   : > { %v3098_v38 = vsub.f32 %v571_v2, %v618_v34  ;;  %v650_v40 = vsel %vm585_vm2, %v632_v36, 0.0  ;;  %v633_v41 = vmul.f32 %v3096_v37, %v3096_v37 }
 0x1b2   : > { %v634_v42 = vmul.f32 %v3098_v38, %v3098_v38  ;;  %v653_v43 = vsel %vm585_vm2, %v633_v41, 0.0 }
 0x1b3   : > { %651 = vadd.xlane.f32.xlu1 %v650_v40  ;;  %654 = vadd.xlane.f32.xlu0 %v653_v43 }
 0x1b4   : > { %v656_v44 = vsel %vm585_vm2, %v634_v42, 0.0 }
 0x1b7   : > { %657 = vadd.xlane.f32.xlu1 %v656_v44 }
 0x230   : > { %v637_v47 = vpop.xlane.xlu0 %636 }
 0x231   : > { %v659_v48 = vmul.f32 0.03125, %v637_v47 }
 0x233   : > { %v667_v49 = vadd.f32 1e-12, %v659_v48 }
 0x234   : > { %v640_v50 = vpop.xlane.xlu1 %639  ;;  %v643_v51 = vpop.xlane.xlu0 %642 }
 0x235   : > { %2701 = vrsqrt.f32 %v667_v49  ;;  %v660_v52 = vmul.f32 0.03125, %v640_v50  ;;  %v661_v53 = vmul.f32 0.03125, %v643_v51 }
 0x237   : > { %v668_v54 = vadd.f32 1e-12, %v660_v52  ;;  %v669_v55 = vadd.f32 1e-12, %v661_v53 }
 0x238   : > { %v646_v57 = vpop.xlane.xlu1 %645  ;;  %v649_v58 = vpop.xlane.xlu0 %648 }
 0x239   : > { %2703 = vrsqrt.f32 %v668_v54  ;;  %v662_v59 = vmul.f32 0.03125, %v646_v57  ;;  %v663_v60 = vmul.f32 0.03125, %v649_v58 }
 0x23a   : > { %2705 = vrsqrt.f32 %v669_v55 }
 0x23b   : > { %v670_v61 = vadd.f32 1e-12, %v662_v59  ;;  %v671_v62 = vadd.f32 1e-12, %v663_v60 }
 0x23c   : > { %v652_v0 = vpop.xlane.xlu1 %651  ;;  %v655_v1 = vpop.xlane.xlu0 %654 }
 0x23d   : > { %2707 = vrsqrt.f32 %v670_v61  ;;  %v664_v2 = vmul.f32 0.03125, %v652_v0  ;;  %v665_v3 = vmul.f32 0.03125, %v655_v1 }
 0x23e   : > { %2709 = vrsqrt.f32 %v671_v62 }
 0x23f   : > { %v672_v4 = vadd.f32 1e-12, %v664_v2  ;;  %v673_v5 = vadd.f32 1e-12, %v665_v3 }
 0x240   : > { %v658_v7 = vpop.xlane.xlu1 %657 }
 0x241   : > { %2711 = vrsqrt.f32 %v672_v4  ;;  %v666_v11 = vmul.f32 0.03125, %v658_v7 }
 0x242   : > { %v2702_v12 = vpop.eup %2701  ;;  %2713 = vrsqrt.f32 %v673_v5 }
 0x243   : > { %v674_v13 = vadd.f32 1e-12, %v666_v11  ;;  %v683_v14 = vmul.f32 %v2702_v12, %v3068_v9 }
 0x245   : > { %2715 = vrsqrt.f32 %v674_v13  ;;  %v695_v22 = vmul.f32 %v694_v15, %v683_v14 }
 0x246   : > { %v2704_v19 = vpop.eup %2703 }
 0x247   : > { %v2706_v20 = vpop.eup %2705  ;;  %v684_v21 = vmul.f32 %v2704_v19, %v3076_v17  ;;  %v707_v30 = vadd.f32 %v706_v23, %v695_v22 }
 0x248   : > { %v685_v24 = vmul.f32 %v2706_v20, %v3070_v10 }
 0x249   : > { %v696_v25 = vmul.f32 %v694_v15, %v684_v21 }
 0x24a   : > { %v2708_v26 = vpop.eup %2707  ;;  %v697_v32 = vmul.f32 %v694_v15, %v685_v24 }
 0x24b   : > { %v2710_v29 = vpop.eup %2709  ;;  %v708_v31 = vadd.f32 %v706_v23, %v696_v25  ;;  %v686_v9 = vmul.f32 %v2708_v26, %v3078_v18  ;;  %v817_v25 = vand.u32 127, %v691_v56 }
 0x24c   : > { %v687_v33 = vmul.f32 %v2710_v29, %v3086_v27  ;;  %v709_v17 = vadd.f32 %v706_v23, %v697_v32  ;;  %v2880_v32 = vmov -1e+30  }
 0x24d   : > { %v715_v34 = vpack.c.bf16 %v708_v31, %v707_v30  ;;  %v698_v35 = vmul.f32 %v694_v15, %v686_v9  ;;  %vm818_vm4 = vcmp.lt.s32.totalorder %v817_v25, 17 }
 0x24e   : > { %v2712_v36 = vpop.eup %2711  ;;  %v699_v41 = vmul.f32 %v694_v15, %v687_v33  ;;  %v3171_v33 = vsel %vm818_vm4, 0.0, %v2880_v32 }
 0x24f   : > { %v2714_v39 = vpop.eup %2713  ;;  %2460 = vmatprep.mubr.msk.bf16.mxu0 %vm585_vm2, %v715_v34  ;;  %v710_v40 = vadd.f32 %v706_v23, %v698_v35  ;;  %v688_v10 = vmul.f32 %v2712_v36, %v3088_v28 }
 0x250   : > { %v689_v42 = vmul.f32 %v2714_v39, %v3096_v37  ;;  %v711_v18 = vadd.f32 %v706_v23, %v699_v41  ;;  %v721_v37 = vsub.s32 2, %v3119_v63 }
 0x251   : > { %v716_v43 = vpack.c.bf16 %v710_v40, %v709_v17  ;;  %v700_v44 = vmul.f32 %v694_v15, %v688_v10 }
 0x252   : > { %v2716_v47 = vpop.eup %2715  ;;  %v701_v49 = vmul.f32 %v694_v15, %v689_v42  ;;  %v722_v55 = vrot.slane %v3123_v8, %v721_v37 }
 0x253   : > { %2461 = vmatmul.mubr.msk.bf16.vlgmr.msra.gmra.mxu0 %vm585_vm2, %v716_v43  ;;  %v712_v27 = vadd.f32 %v706_v23, %v700_v44  ;;  %v690_v48 = vmul.f32 %v2716_v47, %v3098_v38 }
 0x254   : > { %v713_v52 = vadd.f32 %v706_v23, %v701_v49 }
 0x255   : > { %v717_v50 = vpack.c.bf16 %v712_v27, %v711_v18  ;;  %v702_v51 = vmul.f32 %v694_v15, %v690_v48 }
 0x257   : > { %2464 = vmatprep.mubr.msk.bf16.mxu0 %vm585_vm2, %v717_v50  ;;  %v714_v53 = vadd.f32 %v706_v23, %v702_v51 }
 0x259   : > { %v718_v28 = vpack.c.bf16 %v714_v53, %v713_v52 }
 0x25b   : > { %2465 = vmatmul.mubr.msk.bf16.gmra.mxu0 %vm585_vm2, %v718_v28 }
 0x313   : > { %v2462_v54 = vpop.f32.mrf.mxu0 }
 0x314   : > { %v790_v59 = vadd.f32 %v2462_v54, %v722_v55 }
 0x315   : > { %v781_v57 = vpop.f32.mrf.mxu0 }
 0x316   : > { %v782_v61 = vadd.f32 %v781_v57, %v722_v55 }
 0x317   : > { %v2463_v58 = vpop.f32.mrf.mxu0 }
 0x318   : > { %v793_v60 = vadd.f32 %v2463_v58, %v722_v55 }
 0x319   : > { %v784_v38 = vpop.f32.mrf.mxu0 }
 0x31a   : > { %v3142_v62 = vpack.c.bf16 %v793_v60, %v790_v59  ;;  %v785_v0 = vadd.f32 %v784_v38, %v722_v55 }
 0x31b   : > { %v2466_v1 = vpop.f32.mrf.mxu0 }
 0x31c   : > { %v3144_v2 = vpack.c.bf16 %v785_v0, %v782_v61  ;;  %824 = vrot.lane.b32.xlu0 %v3142_v62, %s2879_s23  ;;  %v806_v5 = vadd.f32 %v2466_v1, %v722_v55 }
 0x31d   : > { %v797_v3 = vpop.f32.mrf.mxu0 }
 0x31e   : > { %822 = vrot.lane.b32.xlu1 %v3144_v2, %s2879_s23  ;;  %2472 = vmatprep.mubr.msk.bf16.mxu1 %vm826_vm3, %v3144_v2  ;;  %v798_v11 = vadd.f32 %v797_v3, %v722_v55 }
 0x31f   : > { %v2467_v4 = vpop.f32.mrf.mxu0 }
 0x320   : > { %v809_v6 = vadd.f32 %v2467_v4, %v722_v55 }
 0x321   : > { %v800_v7 = vpop.f32.mrf.mxu0 }
 0x322   : > { %v3150_v12 = vpack.c.bf16 %v809_v6, %v806_v5  ;;  %v801_v13 = vadd.f32 %v800_v7, %v722_v55 }
 0x324   : > { %v3152_v14 = vpack.c.bf16 %v801_v13, %v798_v11  ;;  %892 = vrot.lane.b32.xlu1 %v3150_v12, %s2879_s23 }
 0x326   : > { %2480 = vmatprep.mubr.msk.bf16.mxu0 %vm826_vm3, %v3152_v14 }
 0x328   : > { %890 = vrot.lane.b32.xlu1 %v3152_v14, %s2879_s23 }
 0x38e   : > { %v825_v15 = vpop.permute.xlu0 %824 }
 0x38f   : > { %2600 = vmatprep.subr.msk.bf16.mxu1 %vm826_vm3, %v825_v15  ;;  %v837_v16 = vsel %vm826_vm3, %v825_v15, 0 }
 0x390   : > { %v823_v19 = vpop.permute.xlu1 %822  ;;  %2469 = vmatpush3.bf16.xpose.msra.mxu1 %v837_v16 }
 0x391   : > { %2601 = vmatprep.subr.msk.bf16.mxu1 %vm826_vm3, %v823_v19  ;;  %v834_v22 = vsel %vm826_vm3, %v823_v19, 0 }
 0x396   : > { %v893_v20 = vpop.permute.xlu1 %892 }
 0x397   : > { %v904_v21 = vsel %vm826_vm3, %v893_v20, 0  ;;  %2602 = vmatprep.subr.msk.bf16.mxu0 %vm826_vm3, %v893_v20 }
 0x398   : > { %2471 = vmatpush3.bf16.xpose.msra.mxu1 %v834_v22  ;;  %2477 = vmatpush3.bf16.xpose.msra.mxu0 %v904_v21 }
 0x39a   : > { %v891_v23 = vpop.permute.xlu1 %890 }
 0x39b   : > { %2603 = vmatprep.subr.msk.bf16.mxu0 %vm826_vm3, %v891_v23  ;;  %v901_v24 = vsel %vm826_vm3, %v891_v23, 0 }
 0x39f   : > { %2473 = vmatmul.mubr.msk.bf16.vlgmr.msra.gmra.mxu1 %vm826_vm3, %v3142_v62 }
 0x3a0   : > { %2479 = vmatpush3.bf16.xpose.msra.mxu0 %v901_v24 }
 0x3a7   : > { %2481 = vmatmul.mubr.msk.bf16.vlgmr.msra.gmra.mxu0 %vm826_vm3, %v3150_v12 }
 0x45f   : > { %v2474_v26 = vpop.f32.mrf.mxu1 }
 0x460   : > { %v957_v30 = vmul.f32 0.25, %v2474_v26 }
 0x461   : > { %v873_v29 = vpop.f32.mrf.mxu1 }
 0x462   : > { %v955_v31 = vmul.f32 0.25, %v873_v29  ;;  %v965_v40 = vadd.f32 %v957_v30, %v3171_v33 }
 0x463   : > { %v2475_v9 = vpop.f32.mrf.mxu1 }
 0x464   : > { %v963_v34 = vadd.f32 %v955_v31, %v3171_v33  ;;  %v958_v36 = vmul.f32 0.25, %v2475_v9  ;;  %v977_v43 = vsel %vm585_vm2, %v965_v40, -inf }
 0x465   : > { %v876_v35 = vpop.f32.mrf.mxu1 }
 0x466   : > { %v956_v39 = vmul.f32 0.25, %v876_v35  ;;  %v971_v17 = vsel %vm585_vm2, %v963_v34, -inf  ;;  %v966_v47 = vadd.f32 %v958_v36, %v3171_v33 }
 0x467   : > { %v2482_v10 = vpop.f32.mrf.mxu0  ;;  %972 = vmax.xlane.f32.xlu0 %v971_v17 }
 0x468   : > { %v964_v56 = vadd.f32 %v956_v39, %v3171_v33  ;;  %v961_v27 = vmul.f32 0.25, %v2482_v10  ;;  %v980_v51 = vsel %vm585_vm2, %v966_v47, -inf }
 0x469   : > { %v940_v41 = vpop.f32.mrf.mxu0 }
 0x46a   : > { %v959_v42 = vmul.f32 0.25, %v940_v41  ;;  %v974_v44 = vsel %vm585_vm2, %v964_v56, -inf  ;;  %v969_v54 = vadd.f32 %v961_v27, %v3171_v33 }
 0x46b   : > { %v2483_v18 = vpop.f32.mrf.mxu0  ;;  %978 = vmax.xlane.f32.xlu0 %v977_v43  ;;  %975 = vmax.xlane.f32.xlu1 %v974_v44 }
 0x46c   : > { %v962_v49 = vmul.f32 0.25, %v2483_v18  ;;  %v967_v52 = vadd.f32 %v959_v42, %v3171_v33  ;;  %v989_v57 = vsel %vm585_vm2, %v969_v54, -inf }
 0x46d   : > { %v943_v48 = vpop.f32.mrf.mxu0 }
 0x46e   : > { %v960_v50 = vmul.f32 0.25, %v943_v48  ;;  %v983_v28 = vsel %vm585_vm2, %v967_v52, -inf  ;;  %v970_v55 = vadd.f32 %v962_v49, %v3171_v33 }
 0x46f   : > { %981 = vmax.xlane.f32.xlu0 %v980_v51 }
 0x470   : > { %v968_v53 = vadd.f32 %v960_v50, %v3171_v33  ;;  %v992_v58 = vsel %vm585_vm2, %v970_v55, -inf }
 0x472   : > { %v986_v37 = vsel %vm585_vm2, %v968_v53, -inf }
 0x473   : > { %984 = vmax.xlane.f32.xlu0 %v983_v28  ;;  %987 = vmax.xlane.f32.xlu1 %v986_v37 }
 0x477   : > { %990 = vmax.xlane.f32.xlu0 %v989_v57  ;;  %993 = vmax.xlane.f32.xlu1 %v992_v58 }
 0x488   : > { %1063 = vrot.lane.b32.xlu1 %v3144_v2, %s2881_s29 }
 0x48c   : > { %1126 = vrot.lane.b32.xlu1 %v3150_v12, %s2881_s29 }
 0x48d   : > { %1065 = vrot.lane.b32.xlu0 %v3142_v62, %s2881_s29 }
 0x490   : > { %1191 = vrot.lane.b32.xlu1 %v3142_v62, %s2882_s30 }
 0x491   : > { %1124 = vrot.lane.b32.xlu0 %v3152_v14, %s2881_s29 }
 0x494   : > { %1189 = vrot.lane.b32.xlu1 %v3144_v2, %s2882_s30 }
 0x4f0   : > { %v973_v59 = vpop.xlane.xlu0 %972 }
 0x4f1   : > { %v995_v60 = vsub.f32 %v963_v34, %v973_v59 }
 0x4f3   : > { %v1003_v1 = vmul.f32 1.442695, %v995_v60 }
 0x4f4   : > { %v979_v38 = vpop.xlane.xlu0 %978  ;;  %v976_v61 = vpop.xlane.xlu1 %975 }
 0x4f5   : > { %v997_v0 = vsub.f32 %v965_v40, %v979_v38  ;;  %v996_v4 = vsub.f32 %v964_v56, %v976_v61 }
 0x4f7   : > { %v1007_v3 = vmul.f32 1.442695, %v997_v0  ;;  %v1005_v7 = vmul.f32 1.442695, %v996_v4 }
 0x4f8   : > { %v982_v5 = vpop.xlane.xlu0 %981 }
 0x4f9   : > { %2717 = vpow2.f32 %v1007_v3  ;;  %v998_v6 = vsub.f32 %v966_v47, %v982_v5 }
 0x4fa   : > { %2719 = vpow2.f32 %v1003_v1 }
 0x4fb   : > { %v1009_v11 = vmul.f32 1.442695, %v998_v6 }
 0x4fc   : > { %v985_v13 = vpop.xlane.xlu0 %984  ;;  %v988_v15 = vpop.xlane.xlu1 %987 }
 0x4fd   : > { %2721 = vpow2.f32 %v1009_v11  ;;  %v999_v16 = vsub.f32 %v967_v52, %v985_v13  ;;  %v1000_v19 = vsub.f32 %v968_v53, %v988_v15 }
 0x4fe   : > { %2723 = vpow2.f32 %v1005_v7 }
 0x4ff   : > { %v1011_v24 = vmul.f32 1.442695, %v999_v16  ;;  %v1013_v29 = vmul.f32 1.442695, %v1000_v19 }
 0x500   : > { %v991_v20 = vpop.xlane.xlu0 %990  ;;  %v994_v21 = vpop.xlane.xlu1 %993 }
 0x501   : > { %v1001_v22 = vsub.f32 %v969_v54, %v991_v20  ;;  %v1002_v23 = vsub.f32 %v970_v55, %v994_v21 }
 0x503   : > { %v1015_v25 = vmul.f32 1.442695, %v1001_v22  ;;  %v1017_v26 = vmul.f32 1.442695, %v1002_v23 }
 0x504   : > { %v1066_v30 = vpop.permute.xlu0 %1065  ;;  %v1064_v31 = vpop.permute.xlu1 %1063 }
 0x505   : > { %2725 = vpow2.f32 %v1015_v25  ;;  %2484 = vmatprep.subr.bf16.mxu1 %v1066_v30 }
 0x506   : > { %v3197_v9 = vpop.eup %2717  ;;  %2727 = vpow2.f32 %v1017_v26  ;;  %2485 = vmatpush3.bf16.msra.mxu1 %v1066_v30 }
 0x507   : > { %2729 = vpow2.f32 %v1011_v24  ;;  %2486 = vmatprep.subr.bf16.mxu1 %v1064_v31  ;;  %v1025_v32 = vsel %vm585_vm2, %v3197_v9, 0.0  ;;  %v3201_v34 = vpop.eup %2719 }
 0x508   : > { %2731 = vpow2.f32 %v1013_v29  ;;  %1026 = vadd.xlane.f32.xlu0 %v1025_v32  ;;  %v1127_v35 = vpop.permute.xlu1 %1126  ;;  %v1125_v39 = vpop.permute.xlu0 %1124  ;;  %v1019_v17 = vsel %vm585_vm2, %v3201_v34, 0.0 }
 0x509   : > { %2492 = vmatprep.subr.bf16.mxu0 %v1127_v35 }
 0x50a   : > { %v2722_v36 = vpop.eup %2721  ;;  %2487 = vmatpush3.bf16.msra.mxu1 %v1064_v31  ;;  %2493 = vmatpush3.bf16.msra.mxu0 %v1127_v35 }
 0x50b   : > { %2494 = vmatprep.subr.bf16.mxu0 %v1125_v39  ;;  %v1028_v40 = vsel %vm585_vm2, %v2722_v36, 0.0  ;;  %v2724_v10 = vpop.eup %2723 }
 0x50c   : > { %1020 = vadd.xlane.f32.xlu0 %v1019_v17  ;;  %1029 = vadd.xlane.f32.xlu1 %v1028_v40  ;;  %v1192_v56 = vpop.permute.xlu1 %1191  ;;  %v1022_v41 = vsel %vm585_vm2, %v2724_v10, 0.0 }
 0x50d   : > { %2604 = vmatprep.subr.msk.bf16.mxu1 %vm826_vm3, %v1192_v56  ;;  %v1203_v13 = vsel %vm826_vm3, %v1192_v56, 0 }
 0x50e   : > { %2495 = vmatpush3.bf16.msra.mxu0 %v1125_v39 }
 0x510   : > { %1023 = vadd.xlane.f32.xlu1 %v1022_v41  ;;  %v1190_v50 = vpop.permute.xlu1 %1189 }
 0x511   : > { %v1200_v29 = vsel %vm826_vm3, %v1190_v50, 0 }
 0x512   : > { %v2726_v42 = vpop.eup %2725 }
 0x513   : > { %v2728_v43 = vpop.eup %2727  ;;  %v1037_v44 = vsel %vm585_vm2, %v2726_v42, 0.0 }
 0x514   : > { %v2730_v47 = vpop.eup %2729  ;;  %1038 = vadd.xlane.f32.xlu0 %v1037_v44  ;;  %v1040_v18 = vsel %vm585_vm2, %v2728_v43, 0.0 }
 0x515   : > { %v2732_v27 = vpop.eup %2731  ;;  %1041 = vadd.xlane.f32.xlu1 %v1040_v18  ;;  %v1031_v48 = vsel %vm585_vm2, %v2730_v47, 0.0 }
 0x516   : > { %v1034_v49 = vsel %vm585_vm2, %v2732_v27, 0.0 }
 0x518   : > { %1032 = vadd.xlane.f32.xlu0 %v1031_v48 }
 0x519   : > { %1035 = vadd.xlane.f32.xlu1 %v1034_v49 }
 0x52a   : > { %1185 = vrot.lane.b32.xlu1 %v3144_v2, %s2883_s8 }
 0x52e   : > { %1258 = vrot.lane.b32.xlu1 %v3152_v14, %s2882_s30  ;;  %1260 = vrot.lane.b32.xlu0 %v3150_v12, %s2882_s30 }
 0x532   : > { %1256 = vrot.lane.b32.xlu1 %v3150_v12, %s2883_s8  ;;  %1187 = vrot.lane.b32.xlu0 %v3142_v62, %s2883_s8 }
 0x536   : > { %1254 = vrot.lane.b32.xlu0 %v3152_v14, %s2883_s8 }
 0x591   : > { %v1027_v51 = vpop.xlane.xlu0 %1026 }
 0x595   : > { %v1021_v52 = vpop.xlane.xlu0 %1020  ;;  %v1030_v53 = vpop.xlane.xlu1 %1029 }
 0x596   : > { %2733 = vrcp.f32 %v1030_v53 }
 0x597   : > { %2735 = vrcp.f32 %v1021_v52 }
 0x598   : > { %2737 = vrcp.f32 %v1027_v51 }
 0x599   : > { %v1024_v28 = vpop.xlane.xlu1 %1023 }
 0x59a   : > { %2739 = vrcp.f32 %v1024_v28 }
 0x59d   : > { %v1039_v37 = vpop.xlane.xlu0 %1038 }
 0x59e   : > { %v1042_v54 = vpop.xlane.xlu1 %1041  ;;  %2741 = vrcp.f32 %v1039_v37 }
 0x59f   : > { %2743 = vrcp.f32 %v1042_v54 }
 0x5a1   : > { %v1033_v55 = vpop.xlane.xlu0 %1032 }
 0x5a2   : > { %2745 = vrcp.f32 %v1033_v55  ;;  %v1036_v57 = vpop.xlane.xlu1 %1035 }
 0x5a3   : > { %2747 = vrcp.f32 %v1036_v57  ;;  %v2734_v58 = vpop.eup %2733 }
 0x5a4   : > { %v2736_v59 = vpop.eup %2735  ;;  %v1054_v0 = vmul.f32 %v2734_v58, %v2722_v36 }
 0x5a5   : > { %v1261_v60 = vpop.permute.xlu0 %1260  ;;  %v2738_v38 = vpop.eup %2737  ;;  %v1051_v1 = vmul.f32 %v2736_v59, %v3201_v34 }
 0x5a6   : > { %2606 = vmatprep.subr.msk.bf16.mxu0 %vm826_vm3, %v1261_v60  ;;  %v1053_v4 = vmul.f32 %v2738_v38, %v3197_v9  ;;  %v1186_v15 = vpop.permute.xlu1 %1185  ;;  %v1272_v30 = vsel %vm826_vm3, %v1261_v60, 0 }
 0x5a7   : > { %v2740_v61 = vpop.eup %2739 }
 0x5a8   : > { %v1052_v3 = vmul.f32 %v2740_v61, %v2724_v10  ;;  %v1060_v6 = vpack.c.bf16 %v1054_v0, %v1053_v4 }
 0x5a9   : > { %v1188_v20 = vpop.permute.xlu0 %1187 }
 0x5aa   : > { %v1059_v5 = vpack.c.bf16 %v1052_v3, %v1051_v1  ;;  %v1259_v9 = vpop.permute.xlu1 %1258 }
 0x5ab   : > { %v2742_v7 = vpop.eup %2741  ;;  %v1269_v32 = vsel %vm826_vm3, %v1259_v9, 0 }
 0x5ac   : > { %2488 = vmatprep.mubr.msk.bf16.mxu1 %vm585_vm2, %v1059_v5  ;;  %v2744_v11 = vpop.eup %2743  ;;  %v1057_v22 = vmul.f32 %v2742_v7, %v2726_v42 }
 0x5ad   : > { %2489 = vmatmul.mubr.msk.bf16.vlgmr.msra.gmra.mxu1 %vm585_vm2, %v1060_v6  ;;  %v1058_v23 = vmul.f32 %v2744_v11, %v2728_v43  ;;  %v1255_v31 = vpop.permute.xlu0 %1254 }
 0x5ae   : > { %2501 = vmatpush3.bf16.xpose.msra.mxu1 %v1203_v13  ;;  %2504 = vmatprep.mubr.msk.bf16.mxu1 %vm826_vm3, %v1186_v15  ;;  %v1257_v34 = vpop.permute.xlu1 %1256 }
 0x5af   : > { %v2746_v16 = vpop.eup %2745  ;;  %2605 = vmatprep.subr.msk.bf16.mxu1 %vm826_vm3, %v1190_v50  ;;  %v1062_v26 = vpack.c.bf16 %v1058_v23, %v1057_v22 }
 0x5b0   : > { %v2748_v19 = vpop.eup %2747  ;;  %v1055_v21 = vmul.f32 %v2746_v16, %v2730_v47 }
 0x5b1   : > { %v1056_v24 = vmul.f32 %v2748_v19, %v2732_v27 }
 0x5b3   : > { %v1061_v25 = vpack.c.bf16 %v1056_v24, %v1055_v21 }
 0x5b5   : > { %2496 = vmatprep.mubr.msk.bf16.mxu0 %vm585_vm2, %v1061_v25 }
 0x5b6   : > { %2497 = vmatmul.mubr.msk.bf16.vlgmr.msra.gmra.mxu0 %vm585_vm2, %v1062_v26  ;;  %2503 = vmatpush3.bf16.xpose.msra.mxu1 %v1200_v29 }
 0x5b7   : > { %2509 = vmatpush3.bf16.xpose.msra.mxu0 %v1272_v30  ;;  %2512 = vmatprep.mubr.msk.bf16.mxu0 %vm826_vm3, %v1255_v31 }
 0x5b8   : > { %2607 = vmatprep.subr.msk.bf16.mxu0 %vm826_vm3, %v1259_v9 }
 0x5bd   : > { %2505 = vmatmul.mubr.msk.bf16.vlgmr.msra.gmra.mxu1 %vm826_vm3, %v1188_v20 }
 0x5bf   : > { %2511 = vmatpush3.bf16.xpose.msra.mxu0 %v1269_v32 }
 0x5c6   : > { %2513 = vmatmul.mubr.msk.bf16.vlgmr.msra.gmra.mxu0 %vm826_vm3, %v1257_v34 }
 0x66d   : > { %v3237_v35 = vpop.f32.mrf.mxu1 }
 0x66f   : > { %v3239_v36 = vpop.f32.mrf.mxu1 }
 0x671   : > { %v3241_v39 = vpop.f32.mrf.mxu1 }
 0x673   : > { %v3245_v40 = vpop.f32.mrf.mxu1 }
 0x676   : > { %v3243_v17 = vpop.f32.mrf.mxu0 }
 0x678   : > { %v3247_v10 = vpop.f32.mrf.mxu0 }
 0x67a   : > { %v3249_v42 = vpop.f32.mrf.mxu0 }
 0x67c   : > { %v3252_v48 = vpop.f32.mrf.mxu0 }
 0x67d   : > { %v2506_v56 = vpop.f32.mrf.mxu1 }
 0x67e   : > { %v1325_v43 = vmul.f32 0.25, %v2506_v56 }
 0x67f   : > { %v1239_v41 = vpop.f32.mrf.mxu1 }
 0x680   : > { %v1323_v44 = vmul.f32 0.25, %v1239_v41  ;;  %v1333_v52 = vadd.f32 %v1325_v43, %v3171_v33 }
 0x681   : > { %v2507_v47 = vpop.f32.mrf.mxu1 }
 0x682   : > { %v1331_v18 = vadd.f32 %v1323_v44, %v3171_v33  ;;  %v1326_v49 = vmul.f32 0.25, %v2507_v47  ;;  %v1345_v54 = vsel %vm585_vm2, %v1333_v52, -inf }
 0x683   : > { %v1242_v27 = vpop.f32.mrf.mxu1 }
 0x684   : > { %v1324_v50 = vmul.f32 0.25, %v1242_v27  ;;  %v1339_v51 = vsel %vm585_vm2, %v1331_v18, -inf  ;;  %v1334_v57 = vadd.f32 %v1326_v49, %v3171_v33 }
 0x685   : > { %1340 = vmax.xlane.f32.xlu0 %v1339_v51 }
 0x686   : > { %v2514_v53 = vpop.f32.mrf.mxu0  ;;  %v1332_v28 = vadd.f32 %v1324_v50, %v3171_v33  ;;  %v1348_v61 = vsel %vm585_vm2, %v1334_v57, -inf }
 0x687   : > { %v1329_v60 = vmul.f32 0.25, %v2514_v53 }
 0x688   : > { %v1308_v37 = vpop.f32.mrf.mxu0  ;;  %v1342_v55 = vsel %vm585_vm2, %v1332_v28, -inf }
 0x689   : > { %v1327_v58 = vmul.f32 0.25, %v1308_v37  ;;  %1346 = vmax.xlane.f32.xlu0 %v1345_v54  ;;  %1343 = vmax.xlane.f32.xlu1 %v1342_v55  ;;  %v1337_v6 = vadd.f32 %v1329_v60, %v3171_v33 }
 0x68a   : > { %v2515_v59 = vpop.f32.mrf.mxu0 }
 0x68b   : > { %v1335_v0 = vadd.f32 %v1327_v58, %v3171_v33  ;;  %v1330_v1 = vmul.f32 0.25, %v2515_v59  ;;  %v1357_v13 = vsel %vm585_vm2, %v1337_v6, -inf }
 0x68c   : > { %v1311_v38 = vpop.f32.mrf.mxu0 }
 0x68d   : > { %v1328_v3 = vmul.f32 0.25, %v1311_v38  ;;  %1349 = vmax.xlane.f32.xlu0 %v1348_v61  ;;  %v1351_v5 = vsel %vm585_vm2, %v1335_v0, -inf  ;;  %v1338_v11 = vadd.f32 %v1330_v1, %v3171_v33 }
 0x68f   : > { %v1336_v4 = vadd.f32 %v1328_v3, %v3171_v33  ;;  %v1360_v15 = vsel %vm585_vm2, %v1338_v11, -inf }
 0x691   : > { %1352 = vmax.xlane.f32.xlu0 %v1351_v5  ;;  %v1354_v7 = vsel %vm585_vm2, %v1336_v4, -inf }
 0x692   : > { %1355 = vmax.xlane.f32.xlu1 %v1354_v7 }
 0x695   : > { %1358 = vmax.xlane.f32.xlu0 %v1357_v13 }
 0x696   : > { %1361 = vmax.xlane.f32.xlu1 %v1360_v15 }
 0x70e   : > { %v1341_v16 = vpop.xlane.xlu0 %1340 }
 0x70f   : > { %v1363_v19 = vsub.f32 %v1331_v18, %v1341_v16 }
 0x711   : > { %v1371_v23 = vmul.f32 1.442695, %v1363_v19 }
 0x712   : > { %v1347_v20 = vpop.xlane.xlu0 %1346  ;;  %v1344_v21 = vpop.xlane.xlu1 %1343 }
 0x713   : > { %v1365_v22 = vsub.f32 %v1333_v52, %v1347_v20  ;;  %v1364_v25 = vsub.f32 %v1332_v28, %v1344_v21 }
 0x715   : > { %v1375_v24 = vmul.f32 1.442695, %v1365_v22  ;;  %v1373_v33 = vmul.f32 1.442695, %v1364_v25 }
 0x716   : > { %v1350_v26 = vpop.xlane.xlu0 %1349 }
 0x717   : > { %2749 = vpow2.f32 %v1375_v24  ;;  %v1366_v29 = vsub.f32 %v1334_v57, %v1350_v26 }
 0x718   : > { %2751 = vpow2.f32 %v1371_v23 }
 0x719   : > { %v1377_v30 = vmul.f32 1.442695, %v1366_v29 }
 0x71a   : > { %v1353_v31 = vpop.xlane.xlu0 %1352 }
 0x71b   : > { %2753 = vpow2.f32 %v1377_v30  ;;  %v1367_v9 = vsub.f32 %v1335_v0, %v1353_v31  ;;  %v1356_v54 = vpop.xlane.xlu1 %1355 }
 0x71c   : > { %2755 = vpow2.f32 %v1373_v33  ;;  %v1368_v58 = vsub.f32 %v1336_v4, %v1356_v54 }
 0x71d   : > { %v1379_v56 = vmul.f32 1.442695, %v1367_v9 }
 0x71e   : > { %v1359_v32 = vpop.xlane.xlu0 %1358  ;;  %v1381_v60 = vmul.f32 1.442695, %v1368_v58 }
 0x71f   : > { %v1369_v34 = vsub.f32 %v1337_v6, %v1359_v32  ;;  %v1362_v55 = vpop.xlane.xlu1 %1361 }
 0x720   : > { %v1370_v57 = vsub.f32 %v1338_v11, %v1362_v55 }
 0x721   : > { %v1383_v41 = vmul.f32 1.442695, %v1369_v34 }
 0x722   : > { %v1385_v59 = vmul.f32 1.442695, %v1370_v57 }
 0x723   : > { %2757 = vpow2.f32 %v1383_v41 }
 0x724   : > { %v3269_v43 = vpop.eup %2749  ;;  %2759 = vpow2.f32 %v1379_v56 }
 0x725   : > { %v1393_v44 = vsel %vm585_vm2, %v3269_v43, 0.0  ;;  %v2752_v47 = vpop.eup %2751  ;;  %2761 = vpow2.f32 %v1385_v59 }
 0x726   : > { %1394 = vadd.xlane.f32.xlu0 %v1393_v44  ;;  %v1387_v27 = vsel %vm585_vm2, %v2752_v47, 0.0  ;;  %2763 = vpow2.f32 %v1381_v60 }
 0x728   : > { %v2754_v18 = vpop.eup %2753 }
 0x729   : > { %v1396_v49 = vsel %vm585_vm2, %v2754_v18, 0.0  ;;  %v2756_v50 = vpop.eup %2755 }
 0x72a   : > { %1388 = vadd.xlane.f32.xlu0 %v1387_v27  ;;  %1397 = vadd.xlane.f32.xlu1 %v1396_v49  ;;  %v1390_v51 = vsel %vm585_vm2, %v2756_v50, 0.0 }
 0x72e   : > { %1391 = vadd.xlane.f32.xlu1 %v1390_v51 }
 0x730   : > { %v3276_v52 = vpop.eup %2757 }
 0x731   : > { %v1405_v53 = vsel %vm585_vm2, %v3276_v52, 0.0  ;;  %v3280_v28 = vpop.eup %2759 }
 0x732   : > { %1406 = vadd.xlane.f32.xlu0 %v1405_v53  ;;  %v1399_v37 = vsel %vm585_vm2, %v3280_v28, 0.0  ;;  %v2762_v38 = vpop.eup %2761 }
 0x733   : > { %v1408_v61 = vsel %vm585_vm2, %v2762_v38, 0.0  ;;  %v2764_v0 = vpop.eup %2763 }
 0x734   : > { %v1402_v1 = vsel %vm585_vm2, %v2764_v0, 0.0 }
 0x736   : > { %1400 = vadd.xlane.f32.xlu0 %v1399_v37 }
 0x73f   : > { %1431 = vrot.lane.b32.xlu1 %v3144_v2, %s2884_s9 }
 0x743   : > { %1494 = vrot.lane.b32.xlu1 %v3150_v12, %s2884_s9 }
 0x74c   : > { %1433 = vrot.lane.b32.xlu0 %v3142_v62, %s2884_s9 }
 0x750   : > { %1599 = vrot.lane.b32.xlu0 %v3109_v45, %s2885_s10 }
 0x754   : > { %1597 = vrot.lane.b32.xlu0 %v3112_v46, %s2885_s10 }
 0x767   : > { %1409 = vadd.xlane.f32.xlu1 %v1408_v61 }
 0x76b   : > { %1403 = vadd.xlane.f32.xlu1 %v1402_v1 }
 0x77c   : > { %1492 = vrot.lane.b32.xlu1 %v3152_v14, %s2884_s9 }
 0x7af   : > { %v1395_v2 = vpop.xlane.xlu0 %1394 }
 0x7b3   : > { %v1389_v12 = vpop.xlane.xlu0 %1388  ;;  %v1398_v3 = vpop.xlane.xlu1 %1397 }
 0x7b4   : > { %2765 = vrcp.f32 %v1389_v12 }
 0x7b5   : > { %2767 = vrcp.f32 %v1398_v3 }
 0x7b6   : > { %2769 = vrcp.f32 %v1395_v2 }
 0x7b7   : > { %v1392_v62 = vpop.xlane.xlu1 %1391 }
 0x7b8   : > { %2771 = vrcp.f32 %v1392_v62 }
 0x7bb   : > { %v1407_v4 = vpop.xlane.xlu0 %1406  ;;  %v1432_v5 = vpop.permute.xlu1 %1431 }
 0x7bf   : > { %v1401_v6 = vpop.xlane.xlu0 %1400  ;;  %v1495_v7 = vpop.permute.xlu1 %1494 }
 0x7c0   : > { %2524 = vmatprep.subr.bf16.mxu0 %v1495_v7 }
 0x7c1   : > { %2525 = vmatpush3.bf16.msra.mxu0 %v1495_v7  ;;  %v2766_v11 = vpop.eup %2765 }
 0x7c2   : > { %v2768_v13 = vpop.eup %2767  ;;  %v1419_v19 = vmul.f32 %v2766_v11, %v2752_v47 }
 0x7c3   : > { %v1434_v15 = vpop.permute.xlu0 %1433  ;;  %v2770_v16 = vpop.eup %2769  ;;  %v1422_v21 = vmul.f32 %v2768_v13, %v2754_v18 }
 0x7c4   : > { %2516 = vmatprep.subr.bf16.mxu1 %v1434_v15  ;;  %v1421_v23 = vmul.f32 %v2770_v16, %v3269_v43 }
 0x7c5   : > { %v2772_v14 = vpop.eup %2771  ;;  %2517 = vmatpush3.bf16.msra.mxu1 %v1434_v15 }
 0x7c6   : > { %2518 = vmatprep.subr.bf16.mxu1 %v1432_v5  ;;  %v1420_v20 = vmul.f32 %v2772_v14, %v2756_v50  ;;  %v1428_v24 = vpack.c.bf16 %v1422_v21, %v1421_v23  ;;  %v1690_v14 = vsub.s32 3, %v3119_v63 }
 0x7c7   : > { %v1600_v47 = vpop.permute.xlu0 %1599 }
 0x7c8   : > { %v1427_v22 = vpack.c.bf16 %v1420_v20, %v1419_v19 }
 0x7c9   : > { %2519 = vmatpush3.bf16.msra.mxu1 %v1432_v5 }
 0x7ca   : > { %2520 = vmatprep.mubr.msk.bf16.mxu1 %vm585_vm2, %v1427_v22  ;;  %2532 = vmatprep.subr.bf16.mxu1 %v1600_v47  ;;  %v2814_v22 = vld [vmem:[#allocation2] sm:$0xff] }
 0x7cb   : > { %v1598_v27 = vpop.permute.xlu0 %1597 }
 0x7cc   : > { %2521 = vmatmul.mubr.msk.bf16.vlgmr.msra.gmra.mxu1 %vm585_vm2, %v1428_v24 }
 0x7cd   : > { %2533 = vmatpush3.bf16.msra.mxu1 %v1600_v47 }
 0x7ce   : > { %2534 = vmatprep.subr.bf16.mxu1 %v1598_v27 }
 0x7d1   : > { %2535 = vmatpush3.bf16.msra.mxu1 %v1598_v27 }
 0x7f0   : > { %v1410_v25 = vpop.xlane.xlu1 %1409 }
 0x7f1   : > { %2773 = vrcp.f32 %v1410_v25 }
 0x7f2   : > { %2775 = vrcp.f32 %v1401_v6 }
 0x7f3   : > { %2777 = vrcp.f32 %v1407_v4 }
 0x7f4   : > { %v1404_v26 = vpop.xlane.xlu1 %1403 }
 0x7f5   : > { %2779 = vrcp.f32 %v1404_v26  ;;  %v2815_v26 = vld [vmem:[#allocation2 + $0x18] sm:$0xff] }
 0x7f8   : > { %v1493_v29 = vpop.permute.xlu1 %1492 }
 0x7f9   : > { %2526 = vmatprep.subr.bf16.mxu0 %v1493_v29 }
 0x7fa   : > { %2527 = vmatpush3.bf16.msra.mxu0 %v1493_v29 }
 0x7fe   : > { %v2774_v33 = vpop.eup %2773 }
 0x7ff   : > { %v2776_v30 = vpop.eup %2775  ;;  %v1426_v32 = vmul.f32 %v2774_v33, %v2762_v38  ;;  %v2816_v33 = vld [vmem:[#allocation2 + $0x8] sm:$0xff] }
 0x800   : > { %v2778_v31 = vpop.eup %2777  ;;  %v1423_v34 = vmul.f32 %v2776_v30, %v3280_v28 }
 0x801   : > { %v1425_v41 = vmul.f32 %v2778_v31, %v3276_v52 }
 0x802   : > { %v2780_v9 = vpop.eup %2779 }
 0x803   : > { %v1424_v56 = vmul.f32 %v2780_v9, %v2764_v0  ;;  %v1430_v44 = vpack.c.bf16 %v1426_v32, %v1425_v41 }
 0x805   : > { %v1429_v43 = vpack.c.bf16 %v1424_v56, %v1423_v34 }
 0x807   : > { %2528 = vmatprep.mubr.msk.bf16.mxu0 %vm585_vm2, %v1429_v43 }
 0x808   : > { %2529 = vmatmul.mubr.msk.bf16.vlgmr.msra.gmra.mxu0 %vm585_vm2, %v1430_v44  ;;  %v2817_v44 = vld [vmem:[#allocation2 + $0x30] sm:$0xff] }
 0x88c   : > { %v2522_v18 = vpop.f32.mrf.mxu1 }
 0x88e   : > { %v1477_v49 = vpop.f32.mrf.mxu1 }
 0x890   : > { %v2523_v50 = vpop.f32.mrf.mxu1 }
 0x891   : > { %v2680_v53 = vpack.i.bf16 %v2523_v50, %v2522_v18  ;;  %v2818_v18 = vld [vmem:[#allocation2 + $0x20] sm:$0xff] }
 0x892   : > { %v1480_v51 = vpop.f32.mrf.mxu1 }
 0x893   : > { %v2675_v52 = vpack.i.bf16 %v1480_v51, %v1477_v49 }
 0x895   : > { %2676 = vrot.lane.b32.xlu1 %v2675_v52, %s2886_s12 }
 0x899   : > { %2681 = vrot.lane.b32.xlu1 %v2680_v53, %s2886_s12  ;;  %v2819_v53 = vld [vmem:[#allocation2 + $0x38] sm:$0xff] }
 0x8c8   : > { %v2530_v28 = vpop.f32.mrf.mxu0 }
 0x8ca   : > { %v1538_v37 = vpop.f32.mrf.mxu0 }
 0x8cc   : > { %v2531_v45 = vpop.f32.mrf.mxu0 }
 0x8cd   : > { %v2690_v54 = vpack.i.bf16 %v2531_v45, %v2530_v28 }
 0x8ce   : > { %v1541_v46 = vpop.f32.mrf.mxu0 }
 0x8cf   : > { %v2685_v55 = vpack.i.bf16 %v1541_v46, %v1538_v37  ;;  %2691 = vrot.lane.b32.xlu1 %v2690_v54, %s2886_s12  ;;  %v2820_v37 = vld [vmem:[#allocation2 + $0x28] sm:$0xff] }
 0x8d1   : > { %2686 = vrot.lane.b32.xlu0 %v2685_v55, %s2886_s12 }
 0x907   : > { %v2677_v57 = vpop.permute.xlu1 %2676 }
 0x908   : > { %v2679_v58 = vunpack.i.h.bf16 %v2677_v57  ;;  %v2678_v59 = vunpack.i.l.bf16 %v2677_v57 }
 0x90a   : > { %v1586_v60 = vsel %vm826_vm3, %v3245_v40, %v2679_v58  ;;  %v1585_v38 = vsel %vm826_vm3, %v3239_v36, %v2678_v59 }
 0x90b   : > { %v1593_v61 = vpack.c.bf16 %v1586_v60, %v1585_v38  ;;  %v2682_v0 = vpop.permute.xlu1 %2681 }
 0x90c   : > { %v2684_v1 = vunpack.i.h.bf16 %v2682_v0  ;;  %v2683_v2 = vunpack.i.l.bf16 %v2682_v0 }
 0x90d   : > { %2536 = vmatprep.mubr.msk.bf16.mxu1 %vm585_vm2, %v1593_v61 }
 0x90e   : > { %v1588_v12 = vsel %vm826_vm3, %v3241_v39, %v2684_v1  ;;  %v1587_v3 = vsel %vm826_vm3, %v3237_v35, %v2683_v2 }
 0x90f   : > { %v1594_v62 = vpack.c.bf16 %v1588_v12, %v1587_v3 }
 0x911   : > { %2537 = vmatmul.mubr.msk.bf16.vlgmr.msra.gmra.mxu1 %vm585_vm2, %v1594_v62 }
 0x941   : > { %v2692_v4 = vpop.permute.xlu1 %2691 }
 0x942   : > { %v2694_v40 = vunpack.i.h.bf16 %v2692_v4  ;;  %v2693_v5 = vunpack.i.l.bf16 %v2692_v4 }
 0x943   : > { %v2687_v6 = vpop.permute.xlu0 %2686 }
 0x944   : > { %v2689_v36 = vunpack.i.h.bf16 %v2687_v6  ;;  %v2688_v7 = vunpack.i.l.bf16 %v2687_v6  ;;  %v1592_v11 = vsel %vm826_vm3, %v3249_v42, %v2694_v40  ;;  %v1591_v13 = vsel %vm826_vm3, %v3243_v17, %v2693_v5  ;;  %v2813_v42 = vld [vmem:[#allocation2 + $0x10] sm:$0xff] }
 0x945   : > { %v1596_v16 = vpack.c.bf16 %v1592_v11, %v1591_v13  ;;  %v1691_v17 = vrot.slane %v3123_v8, %v1690_v14  ;;  %v2698_v14 = vld [vmem:[%s2961_s14 + $0x10] sm:$0xff]  }
 0x946   : > { %v1590_v39 = vsel %vm826_vm3, %v3252_v48, %v2689_v36  ;;  %v1589_v35 = vsel %vm826_vm3, %v3247_v10, %v2688_v7 }
 0x947   : > { %v1595_v15 = vpack.c.bf16 %v1590_v39, %v1589_v35 }
 0x949   : > { %2540 = vmatprep.mubr.msk.bf16.mxu1 %vm585_vm2, %v1595_v15 }
 0x94a   : > { %2541 = vmatmul.mubr.msk.bf16.gmra.mxu1 %vm585_vm2, %v1596_v16  ;;  %v2697_v16 = vld [vmem:[%s2961_s14 + $0x18] sm:$0xff]  }
 0x94b   : > { %2544 = vmatprep.subr.bf16.mxu0 %v2697_v16 }
 0x94c   : > { %2545 = vmatpush3.bf16.msra.mxu0 %v2697_v16 }
 0x94d   : > { %2546 = vmatprep.subr.bf16.mxu0 %v2698_v14 }
 0x950   : > { %2547 = vmatpush3.bf16.msra.mxu0 %v2698_v14 }
 0x9d1   : > { %v2538_v19 = vpop.f32.mrf.mxu1 }
 0x9d2   : > { %v1682_v21 = vadd.f32 %v2813_v42, %v2538_v19 }
 0x9d3   : > { %v1649_v20 = vpop.f32.mrf.mxu1 }
 0x9d4   : > { %v1680_v23 = vadd.f32 %v2814_v22, %v1649_v20  ;;  %v3323_v25 = vadd.f32 %v1691_v17, %v1682_v21 }
 0x9d5   : > { %v2539_v48 = vpop.f32.mrf.mxu1 }
 0x9d6   : > { %v3321_v24 = vadd.f32 %v1691_v17, %v1680_v23  ;;  %v1683_v29 = vadd.f32 %v2815_v26, %v2539_v48  ;;  %v1706_v8 = vsel %vm585_vm2, %v3323_v25, 0.0 }
 0x9d7   : > { %v1652_v10 = vpop.f32.mrf.mxu1 }
 0x9d8   : > { %v1681_v30 = vadd.f32 %v2816_v33, %v1652_v10  ;;  %v1700_v31 = vsel %vm585_vm2, %v3321_v24, 0.0  ;;  %v3329_v32 = vadd.f32 %v1691_v17, %v1683_v29 }
 0x9d9   : > { %1701 = vadd.xlane.f32.xlu0 %v1700_v31 }
 0x9da   : > { %v3327_v9 = vadd.f32 %v1691_v17, %v1681_v30  ;;  %v1709_v56 = vsel %vm585_vm2, %v3329_v32, 0.0 }
 0x9dc   : > { %v1703_v34 = vsel %vm585_vm2, %v3327_v9, 0.0 }
 0x9dd   : > { %1707 = vadd.xlane.f32.xlu0 %v1706_v8  ;;  %1704 = vadd.xlane.f32.xlu1 %v1703_v34 }
 0x9e1   : > { %1710 = vadd.xlane.f32.xlu0 %v1709_v56 }
 0xa0a   : > { %v2542_v41 = vpop.f32.mrf.mxu1 }
 0xa0b   : > { %v1686_v47 = vadd.f32 %v2817_v44, %v2542_v41 }
 0xa0c   : > { %v1665_v43 = vpop.f32.mrf.mxu1 }
 0xa0d   : > { %v1684_v27 = vadd.f32 %v2818_v18, %v1665_v43  ;;  %v3339_v52 = vadd.f32 %v1691_v17, %v1686_v47 }
 0xa0e   : > { %v2543_v49 = vpop.f32.mrf.mxu1 }
 0xa0f   : > { %v3337_v50 = vadd.f32 %v1691_v17, %v1684_v27  ;;  %v1687_v28 = vadd.f32 %v2819_v53, %v2543_v49  ;;  %v1718_v57 = vsel %vm585_vm2, %v3339_v52, 0.0 }
 0xa10   : > { %v1668_v51 = vpop.f32.mrf.mxu1 }
 0xa11   : > { %v1685_v45 = vadd.f32 %v2820_v37, %v1668_v51  ;;  %v1712_v54 = vsel %vm585_vm2, %v3337_v50, 0.0  ;;  %v3345_v55 = vadd.f32 %v1691_v17, %v1687_v28 }
 0xa12   : > { %1713 = vadd.xlane.f32.xlu0 %v1712_v54 }
 0xa13   : > { %v3343_v46 = vadd.f32 %v1691_v17, %v1685_v45  ;;  %v1721_v59 = vsel %vm585_vm2, %v3345_v55, 0.0 }
 0xa15   : > { %v1715_v58 = vsel %vm585_vm2, %v3343_v46, 0.0 }
 0xa16   : > { %1719 = vadd.xlane.f32.xlu0 %v1718_v57  ;;  %1716 = vadd.xlane.f32.xlu1 %v1715_v58 }
 0xa1a   : > { %1722 = vadd.xlane.f32.xlu1 %v1721_v59  ;;  %v1806_v59 = vsub.s32 4, %v3119_v63 }
 0xa62   : > { %v1702_v60 = vpop.xlane.xlu0 %1701 }
 0xa63   : > { %v1724_v38 = vmul.f32 0.03125, %v1702_v60 }
 0xa65   : > { %v3354_v61 = vsub.f32 %v3321_v24, %v1724_v38 }
 0xa66   : > { %v1708_v0 = vpop.xlane.xlu0 %1707  ;;  %v1705_v1 = vpop.xlane.xlu1 %1704 }
 0xa67   : > { %v1726_v2 = vmul.f32 0.03125, %v1708_v0  ;;  %v1725_v12 = vmul.f32 0.03125, %v1705_v1  ;;  %v1740_v3 = vmul.f32 %v3354_v61, %v3354_v61  ;;  %v3406_v0 = vld [vmem:[%s2956_s11] sm:$0xff] }
 0xa68   : > { %v1807_v1 = vrot.slane %v3406_v0, %v1806_v59 }
 0xa69   : > { %v3359_v62 = vsub.f32 %v3323_v25, %v1726_v2  ;;  %v3362_v4 = vsub.f32 %v3327_v9, %v1725_v12  ;;  %v1748_v40 = vsel %vm585_vm2, %v1740_v3, 0.0  ;;  %v1818_v2 = vsub.s32 5, %v3119_v63 }
 0xa6a   : > { %v1711_v5 = vpop.xlane.xlu0 %1710  ;;  %1749 = vadd.xlane.f32.xlu0 %v1748_v40 }
 0xa6b   : > { %v1727_v6 = vmul.f32 0.03125, %v1711_v5  ;;  %v1742_v36 = vmul.f32 %v3359_v62, %v3359_v62  ;;  %v1741_v7 = vmul.f32 %v3362_v4, %v3362_v4 }
 0xa6d   : > { %v3370_v11 = vsub.f32 %v3329_v32, %v1727_v6  ;;  %v1754_v13 = vsel %vm585_vm2, %v1742_v36, 0.0  ;;  %v1751_v39 = vsel %vm585_vm2, %v1741_v7, 0.0  ;;  %v1819_v36 = vrot.slane %v3406_v0, %v1818_v2 }
 0xa6e   : > { %1755 = vadd.xlane.f32.xlu0 %v1754_v13  ;;  %1752 = vadd.xlane.f32.xlu1 %v1751_v39 }
 0xa6f   : > { %v1743_v35 = vmul.f32 %v3370_v11, %v3370_v11 }
 0xa71   : > { %v1757_v15 = vsel %vm585_vm2, %v1743_v35, 0.0 }
 0xa72   : > { %1758 = vadd.xlane.f32.xlu1 %v1757_v15 }
 0xa9b   : > { %v1714_v19 = vpop.xlane.xlu0 %1713 }
 0xa9c   : > { %v1728_v20 = vmul.f32 0.03125, %v1714_v19 }
 0xa9e   : > { %v3380_v42 = vsub.f32 %v3337_v50, %v1728_v20 }
 0xa9f   : > { %v1720_v21 = vpop.xlane.xlu0 %1719  ;;  %v1717_v17 = vpop.xlane.xlu1 %1716 }
 0xaa0   : > { %v1730_v22 = vmul.f32 0.03125, %v1720_v21  ;;  %v1729_v23 = vmul.f32 0.03125, %v1717_v17  ;;  %v1744_v48 = vmul.f32 %v3380_v42, %v3380_v42 }
 0xaa2   : > { %v3385_v10 = vsub.f32 %v3339_v52, %v1730_v22  ;;  %v3388_v26 = vsub.f32 %v3343_v46, %v1729_v23  ;;  %v1760_v29 = vsel %vm585_vm2, %v1744_v48, 0.0 }
 0xaa3   : > { %1761 = vadd.xlane.f32.xlu0 %v1760_v29  ;;  %v1723_v33 = vpop.xlane.xlu1 %1722 }
 0xaa4   : > { %v1731_v30 = vmul.f32 0.03125, %v1723_v33  ;;  %v1746_v31 = vmul.f32 %v3385_v10, %v3385_v10  ;;  %v1745_v8 = vmul.f32 %v3388_v26, %v3388_v26 }
 0xaa6   : > { %v3396_v34 = vsub.f32 %v3345_v55, %v1731_v30  ;;  %v1766_v56 = vsel %vm585_vm2, %v1746_v31, 0.0  ;;  %v1763_v41 = vsel %vm585_vm2, %v1745_v8, 0.0 }
 0xaa7   : > { %1767 = vadd.xlane.f32.xlu0 %v1766_v56  ;;  %1764 = vadd.xlane.f32.xlu1 %v1763_v41 }
 0xaa8   : > { %v1747_v43 = vmul.f32 %v3396_v34, %v3396_v34 }
 0xaaa   : > { %v1769_v44 = vsel %vm585_vm2, %v1747_v43, 0.0 }
 0xaab   : > { %1770 = vadd.xlane.f32.xlu1 %v1769_v44 }
 0xaf3   : > { %v1750_v47 = vpop.xlane.xlu0 %1749 }
 0xaf4   : > { %v1772_v18 = vmul.f32 0.03125, %v1750_v47 }
 0xaf6   : > { %v1780_v27 = vadd.f32 1e-12, %v1772_v18 }
 0xaf7   : > { %v1756_v49 = vpop.xlane.xlu0 %1755  ;;  %v1753_v51 = vpop.xlane.xlu1 %1752 }
 0xaf8   : > { %2781 = vrsqrt.f32 %v1780_v27  ;;  %v1774_v53 = vmul.f32 0.03125, %v1756_v49  ;;  %v1773_v28 = vmul.f32 0.03125, %v1753_v51 }
 0xafa   : > { %v1782_v37 = vadd.f32 1e-12, %v1774_v53  ;;  %v1781_v45 = vadd.f32 1e-12, %v1773_v28 }
 0xafb   : > { %v1759_v54 = vpop.xlane.xlu1 %1758 }
 0xafc   : > { %2783 = vrsqrt.f32 %v1782_v37  ;;  %v1775_v57 = vmul.f32 0.03125, %v1759_v54 }
 0xafd   : > { %2785 = vrsqrt.f32 %v1781_v45 }
 0xafe   : > { %v1783_v58 = vadd.f32 1e-12, %v1775_v57 }
 0xb00   : > { %2787 = vrsqrt.f32 %v1783_v58 }
 0xb05   : > { %v2782_v60 = vpop.eup %2781 }
 0xb06   : > { %v1796_v38 = vmul.f32 %v2782_v60, %v3354_v61 }
 0xb08   : > { %v1808_v6 = vmul.f32 %v1807_v1, %v1796_v38 }
 0xb09   : > { %v2784_v12 = vpop.eup %2783 }
 0xb0a   : > { %v2786_v3 = vpop.eup %2785  ;;  %v1798_v40 = vmul.f32 %v2784_v12, %v3359_v62  ;;  %v1820_v35 = vadd.f32 %v1819_v36, %v1808_v6 }
 0xb0b   : > { %v1797_v5 = vmul.f32 %v2786_v3, %v3362_v4 }
 0xb0c   : > { %v1810_v61 = vmul.f32 %v1807_v1, %v1798_v40 }
 0xb0d   : > { %v2788_v7 = vpop.eup %2787  ;;  %v1809_v13 = vmul.f32 %v1807_v1, %v1797_v5 }
 0xb0e   : > { %v1799_v39 = vmul.f32 %v2788_v7, %v3370_v11  ;;  %v1822_v19 = vadd.f32 %v1819_v36, %v1810_v61 }
 0xb0f   : > { %v1821_v15 = vadd.f32 %v1819_v36, %v1809_v13 }
 0xb10   : > { %v1811_v16 = vmul.f32 %v1807_v1, %v1799_v39 }
 0xb11   : > { %v1828_v14 = vpack.c.bf16 %v1821_v15, %v1820_v35 }
 0xb12   : > { %v1823_v20 = vadd.f32 %v1819_v36, %v1811_v16 }
 0xb13   : > { %2548 = vmatprep.mubr.msk.bf16.mxu0 %vm585_vm2, %v1828_v14 }
 0xb14   : > { %v1829_v21 = vpack.c.bf16 %v1823_v20, %v1822_v19 }
 0xb16   : > { %2549 = vmatmul.mubr.msk.bf16.vlgmr.msra.gmra.mxu0 %vm585_vm2, %v1829_v21 }
 0xb2c   : > { %v1762_v62 = vpop.xlane.xlu0 %1761 }
 0xb2d   : > { %v1776_v4 = vmul.f32 0.03125, %v1762_v62 }
 0xb2f   : > { %v1784_v17 = vadd.f32 1e-12, %v1776_v4 }
 0xb30   : > { %v1768_v22 = vpop.xlane.xlu0 %1767  ;;  %v1765_v23 = vpop.xlane.xlu1 %1764 }
 0xb31   : > { %2789 = vrsqrt.f32 %v1784_v17  ;;  %v1778_v48 = vmul.f32 0.03125, %v1768_v22  ;;  %v1777_v11 = vmul.f32 0.03125, %v1765_v23 }
 0xb33   : > { %v1786_v29 = vadd.f32 1e-12, %v1778_v48  ;;  %v1785_v33 = vadd.f32 1e-12, %v1777_v11 }
 0xb34   : > { %v1771_v30 = vpop.xlane.xlu1 %1770 }
 0xb35   : > { %2791 = vrsqrt.f32 %v1786_v29  ;;  %v1779_v31 = vmul.f32 0.03125, %v1771_v30 }
 0xb36   : > { %2793 = vrsqrt.f32 %v1785_v33 }
 0xb37   : > { %v1787_v8 = vadd.f32 1e-12, %v1779_v31 }
 0xb39   : > { %2795 = vrsqrt.f32 %v1787_v8 }
 0xb3e   : > { %v2790_v56 = vpop.eup %2789 }
 0xb3f   : > { %v1800_v41 = vmul.f32 %v2790_v56, %v3380_v42 }
 0xb41   : > { %v1812_v27 = vmul.f32 %v1807_v1, %v1800_v41 }
 0xb42   : > { %v2792_v43 = vpop.eup %2791 }
 0xb43   : > { %v2794_v44 = vpop.eup %2793  ;;  %v1802_v47 = vmul.f32 %v2792_v43, %v3385_v10  ;;  %v1824_v37 = vadd.f32 %v1819_v36, %v1812_v27  ;;  %v2699_v10 = vld [vmem:[%s2961_s14 + $0x28] sm:$0xff]  }
 0xb44   : > { %v1801_v18 = vmul.f32 %v2794_v44, %v3388_v26  ;;  %2556 = vmatprep.subr.bf16.mxu1 %v2699_v10  ;;  %v2700_v26 = vld [vmem:[%s2961_s14 + $0x20] sm:$0xff]  }
 0xb45   : > { %v1814_v28 = vmul.f32 %v1807_v1, %v1802_v47  ;;  %2557 = vmatpush3.bf16.xpose.msra.mxu1 %v2699_v10 }
 0xb46   : > { %v2796_v49 = vpop.eup %2795  ;;  %v1813_v51 = vmul.f32 %v1807_v1, %v1801_v18  ;;  %2558 = vmatprep.subr.bf16.mxu1 %v2700_v26 }
 0xb47   : > { %v1803_v53 = vmul.f32 %v2796_v49, %v3396_v34  ;;  %v1826_v58 = vadd.f32 %v1819_v36, %v1814_v28  ;;  %v1834_v34 = vsub.s32 6, %v3119_v63 }
 0xb48   : > { %v1825_v45 = vadd.f32 %v1819_v36, %v1813_v51 }
 0xb49   : > { %v1815_v54 = vmul.f32 %v1807_v1, %v1803_v53  ;;  %v3426_v60 = vrot.slane %v3406_v0, %v1834_v34 }
 0xb4a   : > { %v1830_v57 = vpack.c.bf16 %v1825_v45, %v1824_v37 }
 0xb4b   : > { %v1827_v42 = vadd.f32 %v1819_v36, %v1815_v54 }
 0xb4c   : > { %2552 = vmatprep.mubr.msk.bf16.mxu0 %vm585_vm2, %v1830_v57 }
 0xb4d   : > { %v1831_v59 = vpack.c.bf16 %v1827_v42, %v1826_v58  ;;  %2559 = vmatpush3.bf16.xpose.msra.mxu1 %v2700_v26 }
 0xb4f   : > { %2553 = vmatmul.mubr.msk.bf16.gmra.mxu0 %vm585_vm2, %v1831_v59 }
 0xbd6   : > { %v2550_v38 = vpop.f32.mrf.mxu0 }
 0xbd7   : > { %v1903_v1 = vadd.f32 %v2550_v38, %v3426_v60 }
 0xbd8   : > { %v1894_v2 = vpop.f32.mrf.mxu0 }
 0xbd9   : > { %v1935_v12 = vmul.f32 %v1903_v1, %v1903_v1  ;;  %v1895_v3 = vadd.f32 %v1894_v2, %v3426_v60  ;;  %v1927_v49 = vmul.f32 0.5, %v1903_v1 }
 0xbda   : > { %v2551_v40 = vpop.f32.mrf.mxu0 }
 0xbdb   : > { %v1943_v5 = vmul.f32 %v1935_v12, %v1903_v1  ;;  %v1933_v6 = vmul.f32 %v1895_v3, %v1895_v3  ;;  %v1906_v36 = vadd.f32 %v2551_v40, %v3426_v60  ;;  %v1925_v47 = vmul.f32 0.5, %v1895_v3 }
 0xbdc   : > { %v1897_v7 = vpop.f32.mrf.mxu0 }
 0xbdd   : > { %v1951_v13 = vmul.f32 0.044715, %v1943_v5  ;;  %v1941_v39 = vmul.f32 %v1933_v6, %v1895_v3  ;;  %v1936_v61 = vmul.f32 %v1906_v36, %v1906_v36  ;;  %v1898_v35 = vadd.f32 %v1897_v7, %v3426_v60 }
 0xbde   : > { %v1928_v44 = vmul.f32 0.5, %v1906_v36 }
 0xbdf   : > { %v1959_v15 = vadd.f32 %v1951_v13, %v1903_v1  ;;  %v1949_v16 = vmul.f32 0.044715, %v1941_v39  ;;  %v1944_v14 = vmul.f32 %v1936_v61, %v1906_v36  ;;  %v1934_v19 = vmul.f32 %v1898_v35, %v1898_v35 }
 0xbe0   : > { %v1926_v18 = vmul.f32 0.5, %v1898_v35 }
 0xbe1   : > { %v1967_v20 = vmul.f32 0.7978846, %v1959_v15  ;;  %v1957_v21 = vadd.f32 %v1949_v16, %v1895_v3  ;;  %v1952_v62 = vmul.f32 0.044715, %v1944_v14  ;;  %v1942_v4 = vmul.f32 %v1934_v19, %v1898_v35 }
 0xbe3   : > { %v1965_v17 = vmul.f32 0.7978846, %v1957_v21  ;;  %v1960_v22 = vadd.f32 %v1952_v62, %v1906_v36  ;;  %v1950_v23 = vmul.f32 0.044715, %v1942_v4  ;;  %2797 = vtanh.f32 %v1967_v20 }
 0xbe5   : > { %v1968_v48 = vmul.f32 0.7978846, %v1960_v22  ;;  %2799 = vtanh.f32 %v1965_v17  ;;  %v1958_v11 = vadd.f32 %v1950_v23, %v1898_v35 }
 0xbe7   : > { %2801 = vtanh.f32 %v1968_v48  ;;  %v1966_v29 = vmul.f32 0.7978846, %v1958_v11 }
 0xbe9   : > { %2803 = vtanh.f32 %v1966_v29 }
 0xbf0   : > { %v2798_v33 = vpop.eup %2797 }
 0xbf1   : > { %v1983_v43 = vadd.f32 1.0, %v2798_v33 }
 0xbf2   : > { %v2800_v30 = vpop.eup %2799 }
 0xbf3   : > { %v1981_v56 = vadd.f32 1.0, %v2800_v30  ;;  %v1991_v37 = vmul.f32 %v1983_v43, %v1927_v49 }
 0xbf4   : > { %v2802_v31 = vpop.eup %2801 }
 0xbf5   : > { %v1984_v8 = vadd.f32 1.0, %v2802_v31  ;;  %v1989_v53 = vmul.f32 %v1981_v56, %v1925_v47 }
 0xbf6   : > { %v2804_v41 = vpop.eup %2803 }
 0xbf7   : > { %v1982_v27 = vadd.f32 1.0, %v2804_v41  ;;  %v1992_v51 = vmul.f32 %v1984_v8, %v1928_v44 }
 0xbf9   : > { %v1990_v28 = vmul.f32 %v1982_v27, %v1926_v18  ;;  %v1998_v54 = vpack.c.bf16 %v1992_v51, %v1991_v37  ;;  %v2088_v27 = vsub.s32 7, %v3119_v63 }
 0xbfb   : > { %v1997_v45 = vpack.c.bf16 %v1990_v28, %v1989_v53  ;;  %v2089_v49 = vrot.slane %v3406_v0, %v2088_v27 }
 0xbfd   : > { %2560 = vmatprep.mubr.bf16.mxu1 %v1997_v45 }
 0xbfe   : > { %2561 = vmatmul.mubr.bf16.vlgmr.msra.gmra.mxu1 %v1998_v54 }
 0xc0f   : > { %v2554_v57 = vpop.f32.mrf.mxu0 }
 0xc10   : > { %v1919_v58 = vadd.f32 %v2554_v57, %v3426_v60 }
 0xc11   : > { %v1910_v42 = vpop.f32.mrf.mxu0 }
 0xc12   : > { %v1939_v59 = vmul.f32 %v1919_v58, %v1919_v58  ;;  %v1911_v10 = vadd.f32 %v1910_v42, %v3426_v60  ;;  %v1931_v8 = vmul.f32 0.5, %v1919_v58 }
 0xc13   : > { %v2555_v26 = vpop.f32.mrf.mxu0 }
 0xc14   : > { %v1947_v34 = vmul.f32 %v1939_v59, %v1919_v58  ;;  %v1937_v38 = vmul.f32 %v1911_v10, %v1911_v10  ;;  %v1922_v1 = vadd.f32 %v2555_v26, %v3426_v60  ;;  %v1929_v33 = vmul.f32 0.5, %v1911_v10 }
 0xc15   : > { %v1913_v2 = vpop.f32.mrf.mxu0 }
 0xc16   : > { %v1955_v12 = vmul.f32 0.044715, %v1947_v34  ;;  %v1945_v3 = vmul.f32 %v1937_v38, %v1911_v10  ;;  %v1940_v40 = vmul.f32 %v1922_v1, %v1922_v1  ;;  %v1914_v5 = vadd.f32 %v1913_v2, %v3426_v60 }
 0xc17   : > { %v1932_v11 = vmul.f32 0.5, %v1922_v1 }
 0xc18   : > { %v1963_v6 = vadd.f32 %v1955_v12, %v1919_v58  ;;  %v1953_v36 = vmul.f32 0.044715, %v1945_v3  ;;  %v1948_v7 = vmul.f32 %v1940_v40, %v1922_v1  ;;  %v1938_v13 = vmul.f32 %v1914_v5, %v1914_v5 }
 0xc19   : > { %v1930_v30 = vmul.f32 0.5, %v1914_v5 }
 0xc1a   : > { %v1961_v39 = vadd.f32 %v1953_v36, %v1911_v10  ;;  %v1956_v61 = vmul.f32 0.044715, %v1948_v7  ;;  %v1946_v35 = vmul.f32 %v1938_v13, %v1914_v5  ;;  %v1971_v15 = vmul.f32 0.7978846, %v1963_v6 }
 0xc1c   : > { %v1969_v16 = vmul.f32 0.7978846, %v1961_v39  ;;  %v1964_v14 = vadd.f32 %v1956_v61, %v1922_v1  ;;  %v1954_v19 = vmul.f32 0.044715, %v1946_v35 }
 0xc1e   : > { %2805 = vtanh.f32 %v1969_v16  ;;  %v1972_v20 = vmul.f32 0.7978846, %v1964_v14  ;;  %v1962_v21 = vadd.f32 %v1954_v19, %v1914_v5 }
 0xc1f   : > { %2807 = vtanh.f32 %v1971_v15 }
 0xc20   : > { %2809 = vtanh.f32 %v1972_v20  ;;  %v1970_v62 = vmul.f32 0.7978846, %v1962_v21 }
 0xc22   : > { %2811 = vtanh.f32 %v1970_v62 }
 0xc2b   : > { %v2806_v4 = vpop.eup %2805 }
 0xc2c   : > { %v2808_v60 = vpop.eup %2807  ;;  %v1985_v22 = vadd.f32 1.0, %v2806_v4 }
 0xc2d   : > { %v2810_v17 = vpop.eup %2809  ;;  %v1987_v29 = vadd.f32 1.0, %v2808_v60 }
 0xc2e   : > { %v1988_v23 = vadd.f32 1.0, %v2810_v17  ;;  %v1993_v41 = vmul.f32 %v1985_v22, %v1929_v33 }
 0xc2f   : > { %v2812_v48 = vpop.eup %2811  ;;  %v1995_v44 = vmul.f32 %v1987_v29, %v1931_v8 }
 0xc30   : > { %v1986_v31 = vadd.f32 1.0, %v2812_v48  ;;  %v1996_v56 = vmul.f32 %v1988_v23, %v1932_v11 }
 0xc32   : > { %v1994_v43 = vmul.f32 %v1986_v31, %v1930_v30  ;;  %v2000_v18 = vpack.c.bf16 %v1996_v56, %v1995_v44 }
 0xc34   : > { %v1999_v47 = vpack.c.bf16 %v1994_v43, %v1993_v41 }
 0xc36   : > { %2564 = vmatprep.mubr.bf16.mxu1 %v1999_v47 }
 0xc37   : > { %2565 = vmatmul.mubr.bf16.gmra.mxu1 %v2000_v18 }
 0xcbe   : > { %v2562_v51 = vpop.f32.mrf.mxu1 }
 0xcbf   : > { %v2080_v53 = vadd.f32 %v2562_v51, %v3323_v25 }
 0xcc0   : > { %v2047_v28 = vpop.f32.mrf.mxu1 }
 0xcc1   : > { %v2092_v37 = vadd.f32 %v2089_v49, %v2080_v53  ;;  %v2078_v45 = vadd.f32 %v2047_v28, %v3321_v24 }
 0xcc2   : > { %v2563_v54 = vpop.f32.mrf.mxu1 }
 0xcc3   : > { %2100 = vst.msk [vmem:[#allocation2 + $0x10] sm:$0xff] %vm585_vm2, %v2092_v37  ;;  %v2090_v57 = vadd.f32 %v2089_v49, %v2078_v45  ;;  %v2081_v58 = vadd.f32 %v2563_v54, %v3329_v32 }
 0xcc4   : > { %v2050_v42 = vpop.f32.mrf.mxu1 }
 0xcc5   : > { %2098 = vst.msk [vmem:[#allocation2] sm:$0xff] %vm585_vm2, %v2090_v57  ;;  %v2093_v59 = vadd.f32 %v2089_v49, %v2081_v58  ;;  %v2079_v63 = vadd.f32 %v2050_v42, %v3327_v9 }
 0xcc7   : > { %2101 = vst.msk [vmem:[#allocation2 + $0x18] sm:$0xff] %vm585_vm2, %v2093_v59  ;;  %v2091_v0 = vadd.f32 %v2089_v49, %v2079_v63 }
 0xcc9   : > { %2099 = vst.msk [vmem:[#allocation2 + $0x8] sm:$0xff] %vm585_vm2, %v2091_v0 }
 0xcf7   : > { %v2566_v25 = vpop.f32.mrf.mxu1 }
 0xcf8   : > { %v2084_v24 = vadd.f32 %v2566_v25, %v3339_v52 }
 0xcf9   : > { %v2063_v10 = vpop.f32.mrf.mxu1 }
 0xcfa   : > { %v2096_v26 = vadd.f32 %v2089_v49, %v2084_v24  ;;  %v2082_v34 = vadd.f32 %v2063_v10, %v3337_v50 }
 0xcfb   : > { %v2567_v38 = vpop.f32.mrf.mxu1 }
 0xcfc   : > { %2104 = vst.msk [vmem:[#allocation2 + $0x30] sm:$0xff] %vm585_vm2, %v2096_v26  ;;  %v2094_v32 = vadd.f32 %v2089_v49, %v2082_v34  ;;  %v2085_v1 = vadd.f32 %v2567_v38, %v3345_v55 }
 0xcfd   : > { %v2066_v2 = vpop.f32.mrf.mxu1 }
 0xcfe   : > { %2102 = vst.msk [vmem:[#allocation2 + $0x20] sm:$0xff] %vm585_vm2, %v2094_v32  ;;  %v2097_v9 = vadd.f32 %v2089_v49, %v2085_v1  ;;  %v2083_v12 = vadd.f32 %v2066_v2, %v3343_v46  ;;  %2109 = sbr.rel (%p2386_p6) target bundleno = 3857 (0xf11), region = 56 }
 0xd00   : > { %2105 = vst.msk [vmem:[#allocation2 + $0x38] sm:$0xff] %vm585_vm2, %v2097_v9  ;;  %v2095_v3 = vadd.f32 %v2089_v49, %v2083_v12 }
 0xd02   : > { %2103 = vst.msk [vmem:[#allocation2 + $0x28] sm:$0xff] %vm585_vm2, %v2095_v3 }
 0xd03   : > { %v2115_v50 = vrot.slane %v2094_v32, 7  ;;  %vm2116_vm5 = vcmask 1041409   ;;  %vm2119_vm6 = vcmask 254976   ;;  %v2822_v15 = vld [vmem:[%s3506_s6 + $0x8] sm:$0xff]   ;;  %v2887_v16 = vmov 0.0   ;;  %v2823_v14 = vld [vmem:[%s3506_s6] sm:$0xff]  }
 0xd04   : > { %2568 = vmatprep.subr.bf16.mxu0 %v2887_v16  ;;  %vm2888_vm7 = vmmov 0   ;;  %v2387_v4 = vld [vmem:[%s3505_s5] ss:$0 sm:$0xff]  ;;  %v2388_v22 = vld [vmem:[%s3505_s5 + $0x1] ss:$0 sm:$0xff] }
 0xd05   : > { %v2117_v52 = vsel %vm2116_vm5, %v2115_v50, %v2090_v57  ;;  %2572 = vmatprep.mubr.msk.bf16.mxu0 %vm2888_vm7, %v2887_v16  ;;  %2569 = vmatpush3.bf16.msra.mxu0 %v2822_v15  ;;  %v2389_v47 = vld [vmem:[%s3505_s5 + $0x2] ss:$0 sm:$0xff] }
 0xd06   : > { %v2120_v55 = vsel %vm2119_vm6, %v2117_v52, 0.0  ;;  %2570 = vmatprep.subr.bf16.mxu0 %v2887_v16 }
 0xd07   : > { %2121 = vadd.xlane.f32.xlu0 %v2120_v55 }
 0xd09   : > { %2571 = vmatpush3.bf16.msra.mxu0 %v2823_v14 }
 0xd90   : > { %v2122_v40 = vpop.xlane.xlu0 %2121 }
 0xd91   : > { %v2123_v5 = vmul.f32 0.03125, %v2122_v40 }
 0xd93   : > { %v2125_v6 = vrot.slane %v2123_v5, 1  ;;  %v2128_v36 = vsub.f32 %v2090_v57, %v2123_v5 }
 0xd95   : > { %v2129_v46 = vsub.f32 %v2094_v32, %v2125_v6  ;;  %v2130_v13 = vmul.f32 %v2128_v36, %v2128_v36 }
 0xd97   : > { %v2131_v7 = vmul.f32 %v2129_v46, %v2129_v46 }
 0xd99   : > { %v2134_v39 = vrot.slane %v2131_v7, 7 }
 0xd9b   : > { %v2135_v61 = vsel %vm2116_vm5, %v2134_v39, %v2130_v13 }
 0xd9c   : > { %v2137_v35 = vsel %vm2119_vm6, %v2135_v61, 0.0 }
 0xd9d   : > { %2138 = vadd.xlane.f32.xlu0 %v2137_v35 }
 0xe26   : > { %v2139_v19 = vpop.xlane.xlu0 %2138 }
 0xe27   : > { %v2140_v20 = vmul.f32 0.03125, %v2139_v19 }
 0xe29   : > { %v2141_v21 = vadd.f32 1e-12, %v2140_v20 }
 0xe2b   : > { %2824 = vrsqrt.f32 %v2141_v21 }
 0xe38   : > { %v2825_v62 = vpop.eup %2824 }
 0xe39   : > { %v2144_v60 = vrot.slane %v2825_v62, 1  ;;  %v2147_v17 = vmul.f32 %v2825_v62, %v2128_v36 }
 0xe3b   : > { %v2148_v23 = vmul.f32 %v2144_v60, %v2129_v46  ;;  %v2153_v48 = vmul.f32 %v2387_v4, %v2147_v17 }
 0xe3d   : > { %v2154_v11 = vmul.f32 %v2387_v4, %v2148_v23  ;;  %v2159_v29 = vadd.f32 %v2388_v22, %v2153_v48 }
 0xe3f   : > { %v2160_v33 = vadd.f32 %v2388_v22, %v2154_v11  ;;  %v2161_v30 = vpack.c.bf16 %v2159_v29, %v2159_v29 }
 0xe41   : > { %v2162_v31 = vpack.c.bf16 %v2160_v33, %v2160_v33  ;;  %v2173_v56 = vunpack.c.l.b16 %v2161_v30 }
 0xe43   : > { %v2174_v8 = vunpack.c.l.b16 %v2162_v31 }
 0xe45   : > { %v2175_v41 = vrot.slane %v2174_v8, 7 }
 0xe47   : > { %v2176_v43 = vsel %vm2116_vm5, %v2175_v41, %v2173_v56 }
 0xe48   : > { %v2177_v44 = vpack.c.b16 %v2176_v43, %v2176_v43 }
 0xe4a   : > { %2573 = vmatmul.mubr.msk.bf16.vlgmr.msra.gmra.mxu0 %vm585_vm2, %v2177_v44 }
 0xf0a   : > { %v2227_v18 = vpop.f32.mrf.mxu0 }
 0xf0b   : > { %v2228_v27 = vadd.f32 %v2389_v47, %v2227_v18 }
 0xf0c   : > { %v2574_v49 = vpop.f32.mrf.mxu0 }
 0xf0d   : > { %2233 = vst [vmem:[#allocation3] sm:$0x3] %v2228_v27 }
 0xf0e   : > { %v2230_v51 = vpop.f32.mrf.mxu0 }
 0xf10   : > { %v2575_v53 = vpop.f32.mrf.mxu0 }
 0xf11 PF: > { %p3476_p7 = scmp.eq.s32.totalorder %s2320_s27, 1  ;;  %s2889_s22 = smov [#allocation3]  }
 0xf12   : > { %s2243_s23 = sshll.u32 %s2889_s22, 4  ;;  %s2244_s23 = int_to_ptr.vmem [resolvable:$true] %s2243_s23 }
 0xf13   : > { %s2826_s29 = scalar_lea.vmem %s2244_s23, 32  ;;  %p2833_p11 = scmp.lt.s32.totalorder %s2244_s23, %s2244_s23 }
 0xf14   : > { %p2827_p8 = scmp.ne.s32.totalorder %s2244_s23, %s2826_s29  ;;  %p2834_p12 = scmp.lt.s32.totalorder %s2826_s29, %s2826_s29 }
 0xf16   : > { %p2828_p9 = pnand %p2827_p8, %p3476_p7  ;;  %p2835_p13 = por %p2834_p12, %p2833_p11 }
 0xf18   : > { %p2829_p10 = pneg %p2828_p9 }
 0xf1a   : > { %p2836_p0 = pnand %p2835_p13, %p2829_p10 }
 0xf1c   : > { %2839 = shalt.err (!%p2836_p0)
}
 0xf1d   : > { %2610 = dma.vmem_to_hbm [thread:$0]  (%p3476_p7), %s2244_s23, 32, %s3507_s7, [#allocation4]  }
 0xf1e   : > { %2863 = dma.done.wait (%p3476_p7), [#allocation4], 32  }
 0xf1f   : > { %2865 = vsyncadd (%p3476_p7), [#allocation4], 4294967264 }
 0xf20 PF: > { %s18_s26 = sadd.s32 1, %s2876_s26   ;;  %s3509_s24 = smov %s2872_s25 }
 0xf21   : > { %p15_p1 = scmp.ge.s32.totalorder %s18_s26, 4   ;;  %s3510_s25 = smov %s3512_s28 }
 0xf23   :  { %17 = sbr.rel (!%p15_p1) target bundleno = 2 (0x2), region = 90 }
 0xf28   :  { %2256 = vsyncpa [#allocation4], 1 }
 0xf29   :  { %2258 = vsyncpa [#allocation4 + $0x1], 1 }

</bundles_post_ra>
